<compile_context>
chip_gen: v6e
topology: v6e:2x2x1
jax: 0.10.0
libtpu: 0.0.40
codegen_flags: <defaults>
</compile_context>

<pallas_src>
import functools

import jax
import jax.numpy as jnp
from jax.experimental import pallas as pl
from jax.experimental.pallas import tpu as pltpu


# ----------------------------------------------------------------------------- #
# Pallas kernel: WB windows per grid step, all heads in-kernel.
# ----------------------------------------------------------------------------- #
def _window_attn_kernel(x_ref, v_ref, bias_ref, *rest, num_heads, dim, v_dim,
                        n_tokens, win_block, n_mask_windows, has_mask,
                        compute_dtype):
    if has_mask:
        mask_ref, wqk_ref, bqk_ref, wproj_ref, bproj_ref, o_ref = rest
    else:
        mask_ref = None
        wqk_ref, bqk_ref, wproj_ref, bproj_ref, o_ref = rest

    N = n_tokens
    WB = win_block
    hd = dim // num_heads
    hdv = v_dim // num_heads

    x2 = x_ref[...]                                            # (WB*N, C)
    # Fused QK projection: one large MXU GEMM, f32 accumulation.  The softmax
    # scale is pre-folded into the Q columns of wqk / bqk (wrapper).
    qk = jnp.dot(x2, wqk_ref[...], preferred_element_type=jnp.float32)
    qk = qk + bqk_ref[...]                                     # (WB*N, 2C) f32

    v3 = v_ref[...].reshape(WB, N, v_dim)                      # (WB, N, v_dim)
    bias = bias_ref[...]                                       # (nH, N, N) f32
    if has_mask:
        mask = mask_ref[...]                                   # (nW, N, N) f32
        g = WB // n_mask_windows

    head_outs = []
    # Static per-head loop (num_heads is small for this module).
    for h in range(num_heads):
        # N is padded to a multiple of 8 by the wrapper, so these reshapes are
        # sublane-aligned (no relayout copies).
        q_h = qk[:, h * hd:(h + 1) * hd].reshape(WB, N, hd).astype(compute_dtype)
        k_h = qk[:, dim + h * hd: dim + (h + 1) * hd].reshape(WB, N, hd) \
                .astype(compute_dtype)

        # Batched over windows; contracts last dims (no explicit transpose).
        s = jnp.einsum('wnd,wmd->wnm', q_h, k_h,
                       preferred_element_type=jnp.float32)     # (WB, N, N) f32

        # Relative-position bias + (optional) shifted-window mask, added from
        # two small tensors (not a pre-fused (nH,nW,N,N) tensor).
        if has_mask:
            # Assumes windows are ordered window-index-fastest within B_,
            # exactly matching the PyTorch view(B_//nW, nW, ...) semantics.
            s = (s.reshape(g, n_mask_windows, N, N) + (mask + bias[h])) \
                    .reshape(WB, N, N)
        else:
            s = s + bias[h]

        # Numerically-stable softmax (f32 vector math); divide on the EUP.
        s = s - jnp.max(s, axis=-1, keepdims=True)
        p = jnp.exp(s)
        p = p * pl.reciprocal(jnp.sum(p, axis=-1, keepdims=True), approx=True)

        v_h = v3[:, :, h * hdv:(h + 1) * hdv]                  # (WB, N, hdv)
        o_h = jnp.einsum('wnm,wmd->wnd', p.astype(compute_dtype), v_h,
                         preferred_element_type=jnp.float32)   # (WB, N, hdv)
        head_outs.append(o_h.reshape(WB * N, hdv))

    # Assemble the attention context in registers (single lane-axis concat):
    # no VMEM ctx scratch and no per-head masked partial stores.
    ctx = head_outs[0] if num_heads == 1 else jnp.concatenate(head_outs, axis=-1)

    # Output projection: one large MXU GEMM over all WB*N rows.
    out = jnp.dot(ctx.astype(compute_dtype), wproj_ref[...],
                  preferred_element_type=jnp.float32)
    out = out + bproj_ref[...]
    o_ref[...] = out.astype(o_ref.dtype)


# ----------------------------------------------------------------------------- #
# VMEM-budget / grid-aware window-block selection
# ----------------------------------------------------------------------------- #
def _vmem_info_bytes():
    try:
        cap = int(pltpu.get_tpu_info().vmem_capacity_bytes)
    except Exception:
        cap = 64 << 20                      # conservative (v7x per-core VMEM)
    return int(cap * 0.45), cap             # (per-step budget, capacity)


def _choose_window_block(B_, nW, N, C, v_dim, num_heads, operand_bytes,
                         vmem_budget):
    """Largest WB (multiple of nW dividing B_) whose per-step footprint fits
    the VMEM budget, capped so the grid keeps >= 2 steps when possible."""
    g_max = B_ // nW
    divisors = [g for g in range(1, g_max + 1) if g_max % g == 0]

    def step_bytes(wb):
        rows = wb * N
        io_slabs = rows * (C + 2 * v_dim) * operand_bytes * 2   # x, v, out (2-buf)
        qk_f32 = rows * 2 * C * 4                               # fused-QK f32
        attn = wb * N * N * 4 * 2                               # scores + probs
        ctx = rows * v_dim * 4                                  # concat context
        consts = ((C * 2 * C + v_dim * v_dim + 3 * v_dim) * operand_bytes
                  + (num_heads + nW) * N * N * 4)               # 1-buf constants
        return io_slabs + qk_f32 + attn + ctx + consts

    best = 1
    for g in divisors:
        if step_bytes(g * nW) <= vmem_budget:
            best = g
    # Keep >= 2 grid steps when possible: gives the pipeline work to overlap
    # and lets v7x shard the "parallel" axis over both TensorCores.
    while best > 1 and g_max // best < 2:
        best = max(g for g in divisors if g < best)
    return best * nW, step_bytes(best * nW)


# ----------------------------------------------------------------------------- #
# Wrapper
# ----------------------------------------------------------------------------- #
def window_attention_pallas(x, v, mask, params, *, window_size, num_heads,
                            qk_scale=None, use_bf16_matmul=False):
    """x: (B_, N, C), v: (B_, N, v_dim), mask: (nW, N, N) or None."""
    B_, N, C = x.shape
    v_dim = v.shape[-1]
    assert C == v_dim, "self.dim != v.shape[-1]"
    assert C % num_heads == 0 and v_dim % num_heads == 0
    out_dtype = x.dtype
    head_dim = C // num_heads
    scale = qk_scale if qk_scale is not None else head_dim ** (-0.5)

    rel_bias = _relative_position_bias(params["rel_pos_table"], window_size,
                                       num_heads)               # (nH, N, N) f32

    has_mask = mask is not None
    if has_mask:
        nW = mask.shape[0]
        assert B_ % nW == 0, "B_ must be a multiple of num_windows"
        mask_f32 = mask.astype(jnp.float32)
    else:
        nW = 1
        mask_f32 = None

    # Sublane padding: keep the token axis a multiple of 8 so in-kernel
    # reshapes never cross (8,128) tile boundaries.  Padded key columns get a
    # -1e9 bias (=> ~zero softmax weight); padded V rows are zero; padded
    # query rows are dropped after the call.
    N_pad = ((N + 7) // 8) * 8
    if N_pad != N:
        x = jnp.pad(x, ((0, 0), (0, N_pad - N), (0, 0)))
        v = jnp.pad(v, ((0, 0), (0, N_pad - N), (0, 0)))
        rb = jnp.zeros((num_heads, N_pad, N_pad), jnp.float32)
        rb = rb.at[:, :, N:].set(-1e9)
        rel_bias = rb.at[:, :N, :N].set(rel_bias)
        if has_mask:
            mask_f32 = jnp.pad(mask_f32,
                               ((0, 0), (0, N_pad - N), (0, N_pad - N)))

    # One-time parameter prep: fold the softmax scale into the Q half.
    wqk = params["wqk"]                                          # (C, 2C)
    bqk = params["bqk"]                                          # (2C,)
    wqk = jnp.concatenate([wqk[:, :C] * scale, wqk[:, C:]], axis=1)
    bqk = jnp.concatenate([bqk[:C] * scale, bqk[C:]]).reshape(1, 2 * C)
    wproj = params["wproj"]                                      # (v_dim, v_dim)
    bproj = params["bproj"].reshape(1, v_dim)

    # bf16 MXU operands are profitable on v5e / v6e / v7x alike (MXU natively
    # consumes bf16); all softmax vector math stays in f32 inside the kernel.
    compute_dtype = jnp.bfloat16 if use_bf16_matmul else jnp.float32
    op_bytes = jnp.dtype(compute_dtype).itemsize

    budget, vmem_cap = _vmem_info_bytes()
    WB, est_bytes = _choose_window_block(B_, nW, N_pad, C, v_dim, num_heads,
                                         op_bytes, budget)
    grid = (B_ // WB,)
    vmem_limit = int(min(max(int(1.5 * est_bytes), 32 << 20),
                         int(0.75 * vmem_cap)))

    # Flatten (B_, N_pad, C) -> (B_*N_pad, C): free wrapper-side reshape, lets
    # the kernel see one (WB*N_pad, C) slab per grid step.
    x2 = x.reshape(B_ * N_pad, C).astype(compute_dtype)
    v2 = v.reshape(B_ * N_pad, v_dim).astype(compute_dtype)
    wqk_in = wqk.astype(compute_dtype)
    wproj_in = wproj.astype(compute_dtype)

    kernel = functools.partial(
        _window_attn_kernel, num_heads=num_heads, dim=C, v_dim=v_dim,
        n_tokens=N_pad, win_block=WB, n_mask_windows=nW, has_mask=has_mask,
        compute_dtype=compute_dtype)

    operands = [x2, v2, rel_bias]
    if has_mask:
        operands.append(mask_f32)
    operands += [wqk_in, bqk, wproj_in, bproj]

    def build_and_run(single_buffer_consts):
        def const_spec(shape):
            # Grid-invariant operand: constant index_map, so double-buffering
            # only doubles VMEM residency -> request a single buffer.
            zeros = (0,) * len(shape)
            idx = lambda b, _z=zeros: _z
            if single_buffer_consts:
                return pl.BlockSpec(shape, idx, pipeline_mode=pl.Buffered(1))
            return pl.BlockSpec(shape, idx)

        in_specs = [
            pl.BlockSpec((WB * N_pad, C), lambda b: (b, 0)),        # x slab
            pl.BlockSpec((WB * N_pad, v_dim), lambda b: (b, 0)),    # v slab
            const_spec((num_heads, N_pad, N_pad)),                  # rel bias
        ]
        if has_mask:
            in_specs.append(const_spec((nW, N_pad, N_pad)))         # window mask
        in_specs += [
            const_spec((C, 2 * C)),                                 # wqk
            const_spec((1, 2 * C)),                                 # bqk
            const_spec((v_dim, v_dim)),                             # wproj
            const_spec((1, v_dim)),                                 # bproj
        ]

        grid_spec = pltpu.PrefetchScalarGridSpec(
            num_scalar_prefetch=0,
            grid=grid,
            in_specs=in_specs,
            out_specs=pl.BlockSpec((WB * N_pad, v_dim), lambda b: (b, 0)),
        )
        return pl.pallas_call(
            kernel,
            out_shape=jax.ShapeDtypeStruct((B_ * N_pad, v_dim), out_dtype),
            grid_spec=grid_spec,
            compiler_params=pltpu.CompilerParams(
                dimension_semantics=("parallel",),
                vmem_limit_bytes=vmem_limit),
        )(*operands)

    try:
        out2 = build_and_run(single_buffer_consts=True)
    except Exception:
        # Fallback for JAX builds that reject pipeline_mode=pl.Buffered(1);
        # identical kernel, default (double) buffering on constants.
        out2 = build_and_run(single_buffer_consts=False)

    out = out2.reshape(B_, N_pad, v_dim)
    if N_pad != N:
        out = out[:, :N, :]
    return out


# ----------------------------------------------------------------------------- #
# Glue: relative position index / bias (mirrors PyTorch buffer construction)
# ----------------------------------------------------------------------------- #
def _relative_position_index(window_size):
    Wh, Ww = window_size
    coords_h = jnp.arange(Wh)
    coords_w = jnp.arange(Ww)
    coords = jnp.stack(jnp.meshgrid(coords_h, coords_w, indexing="ij"))   # (2, Wh, Ww)
    coords_flatten = coords.reshape(2, -1)                                # (2, N)
    rel = coords_flatten[:, :, None] - coords_flatten[:, None, :]         # (2, N, N)
    rel = rel.transpose(1, 2, 0)                                          # (N, N, 2)
    rel = rel.at[:, :, 0].add(Wh - 1)
    rel = rel.at[:, :, 1].add(Ww - 1)
    rel = rel.at[:, :, 0].multiply(2 * Ww - 1)
    return rel.sum(-1)                                                    # (N, N)


def _relative_position_bias(table, window_size, num_heads):
    Wh, Ww = window_size
    N = Wh * Ww
    idx = _relative_position_index(window_size).reshape(-1)               # (N*N,)
    bias = table[idx].reshape(N, N, num_heads)                            # gather
    return jnp.transpose(bias, (2, 0, 1)).astype(jnp.float32)             # (nH, N, N)


# ----------------------------------------------------------------------------- #
# Pure-JAX reference (mirrors PyTorch forward) for correctness checking
# ----------------------------------------------------------------------------- #
def window_attention_ref(x, v, mask, params, *, window_size, num_heads,
                         qk_scale=None):
    B_, N, C = x.shape
    hd = C // num_heads
    scale = qk_scale if qk_scale is not None else hd ** (-0.5)

    qk = x @ params["wqk"] + params["bqk"]                         # (B_, N, 2C)
    qk = qk.reshape(B_, N, 2, num_heads, hd).transpose(2, 0, 3, 1, 4)
    q, k = qk[0], qk[1]                                            # (B_, nH, N, hd)
    q = q * scale
    attn = q @ jnp.swapaxes(k, -2, -1)                             # (B_, nH, N, N)

    rel_bias = _relative_position_bias(params["rel_pos_table"], window_size,
                                       num_heads)
    attn = attn + rel_bias[None]

    if mask is not None:
        nW = mask.shape[0]
        attn = attn.reshape(B_ // nW, nW, num_heads, N, N) + mask[None, :, None]
        attn = attn.reshape(-1, num_heads, N, N)
    attn = jax.nn.softmax(attn, axis=-1)

    v_dim = v.shape[-1]
    vh = v.reshape(B_, N, num_heads, v_dim // num_heads).transpose(0, 2, 1, 3)
    out = (attn @ vh).transpose(0, 2, 1, 3).reshape(B_, N, C)
    return out @ params["wproj"] + params["bproj"]


# ----------------------------------------------------------------------------- #
# Deterministic parameter init
# ----------------------------------------------------------------------------- #
def init_params(key, dim, window_size, num_heads, v_dim):
    Wh, Ww = window_size
    k1, k2, k3, k4, k5 = jax.random.split(key, 5)
    n_rel = (2 * Wh - 1) * (2 * Ww - 1)
    return {
        # trunc_normal_(std=0.02)
        "rel_pos_table": 0.02 * jax.random.truncated_normal(
            k1, -2.0, 2.0, (n_rel, num_heads), dtype=jnp.float32),
        "wqk": 0.05 * jax.random.normal(k2, (dim, 2 * dim), dtype=jnp.float32),
        "bqk": 0.05 * jax.random.normal(k3, (2 * dim,), dtype=jnp.float32),
        "wproj": 0.05 * jax.random.normal(k4, (v_dim, v_dim), dtype=jnp.float32),
        "bproj": 0.05 * jax.random.normal(k5, (v_dim,), dtype=jnp.float32),
    }


if __name__ == "__main__":
    def run_case(window_size, with_mask, use_bf16, tol):
        dim, num_heads, v_dim = 32, 2, 32
        N = window_size[0] * window_size[1]
        batch, nW = 2, 4
        B_ = batch * nW

        key = jax.random.PRNGKey(0)
        kp, kx, kv, km = jax.random.split(key, 4)
        params = init_params(kp, dim, window_size, num_heads, v_dim)
        x = jax.random.normal(kx, (B_, N, dim), dtype=jnp.float32)
        v = jax.random.normal(kv, (B_, N, v_dim), dtype=jnp.float32)
        mask = None
        if with_mask:
            # (0 / -100)-style shifted-window mask, as in the PyTorch pipeline.
            mask = jnp.where(jax.random.bernoulli(km, 0.2, (nW, N, N)),
                             jnp.float32(-100.0), jnp.float32(0.0))

        ref = window_attention_ref(x, v, mask, params,
                                   window_size=window_size, num_heads=num_heads)
        out = jax.block_until_ready(window_attention_pallas(
            x, v, mask, params, window_size=window_size, num_heads=num_heads,
            use_bf16_matmul=use_bf16))
        assert out.shape == ref.shape
        assert jnp.allclose(out, ref, atol=tol, rtol=tol), (
            f"mismatch: window={window_size} mask={with_mask} bf16={use_bf16}")

    # f32 MXU operands, masked (tight-ish tolerance; approx EUP reciprocal).
    run_case((4, 4), True, False, 5e-3)
    # bf16 MXU operands (valid on v5e/v6e/v7x), f32 accumulation + f32 softmax.
    run_case((4, 4), True, True, 3e-2)
    # mask=None specialization (no mask input stream at all).
    run_case((4, 4), False, False, 5e-3)
    # Non-multiple-of-8 token count (N=9 -> padded to 16) exercises padding.
    run_case((3, 3), True, False, 5e-3)

    print("KERNEL_OK")
</pallas_src>

<mosaic_0001>
module attributes {stable_mosaic.version = 11 : i64} {
  func.func @_window_attn_kernel(%arg0: i32, %arg1: memref<64x32xf32, #tpu.memory_space<vmem>>, %arg2: memref<64x32xf32, #tpu.memory_space<vmem>>, %arg3: memref<2x16x16xf32, #tpu.memory_space<vmem>>, %arg4: memref<4x16x16xf32, #tpu.memory_space<vmem>>, %arg5: memref<32x64xf32, #tpu.memory_space<vmem>>, %arg6: memref<1x64xf32, #tpu.memory_space<vmem>>, %arg7: memref<32x32xf32, #tpu.memory_space<vmem>>, %arg8: memref<1x32xf32, #tpu.memory_space<vmem>>, %arg9: memref<64x32xf32, #tpu.memory_space<vmem>>) attributes {dimension_semantics = [#tpu.dimension_semantics<parallel>], iteration_bounds = array<i64: 2>, scalar_prefetch = 0 : i64, scratch_operands = 0 : i64, tpu.core_type = #tpu.core_type<tc>, window_params = [{transform_indices = @transform_0, window_bounds = array<i64: 64, 32>}, {transform_indices = @transform_1, window_bounds = array<i64: 64, 32>}, {pipeline_mode = #tpu.pipeline_mode<synchronous>, transform_indices = @transform_2, window_bounds = array<i64: 2, 16, 16>}, {pipeline_mode = #tpu.pipeline_mode<synchronous>, transform_indices = @transform_3, window_bounds = array<i64: 4, 16, 16>}, {pipeline_mode = #tpu.pipeline_mode<synchronous>, transform_indices = @transform_4, window_bounds = array<i64: 32, 64>}, {pipeline_mode = #tpu.pipeline_mode<synchronous>, transform_indices = @transform_5, window_bounds = array<i64: 1, 64>}, {pipeline_mode = #tpu.pipeline_mode<synchronous>, transform_indices = @transform_6, window_bounds = array<i64: 32, 32>}, {pipeline_mode = #tpu.pipeline_mode<synchronous>, transform_indices = @transform_7, window_bounds = array<i64: 1, 32>}, {transform_indices = @transform_8, window_bounds = array<i64: 64, 32>}]} {
    %c0 = arith.constant 0 : index
    %c0_0 = arith.constant 0 : index
    %0 = vector.load %arg1[%c0, %c0_0] : memref<64x32xf32, #tpu.memory_space<vmem>>, vector<64x32xf32>
    %c0_1 = arith.constant 0 : index
    %c0_2 = arith.constant 0 : index
    %1 = vector.load %arg5[%c0_1, %c0_2] : memref<32x64xf32, #tpu.memory_space<vmem>>, vector<32x64xf32>
    %cst = arith.constant dense<0.000000e+00> : vector<64x64xf32>
    %2 = tpu.matmul %0, %1, %cst {dimension_numbers = #tpu.dot_dimension_numbers<[1], [0], [0], [1], [0, 0, 1, 1], [], []>} : vector<64x32xf32>, vector<32x64xf32>, vector<64x64xf32> -> vector<64x64xf32>
    %c0_3 = arith.constant 0 : index
    %c0_4 = arith.constant 0 : index
    %3 = vector.load %arg6[%c0_3, %c0_4] : memref<1x64xf32, #tpu.memory_space<vmem>>, vector<1x64xf32>
    %4 = vector.broadcast %3 : vector<1x64xf32> to vector<64x64xf32>
    %5 = arith.addf %2, %4 : vector<64x64xf32>
    %c0_5 = arith.constant 0 : index
    %c0_6 = arith.constant 0 : index
    %6 = vector.load %arg2[%c0_5, %c0_6] : memref<64x32xf32, #tpu.memory_space<vmem>>, vector<64x32xf32>
    %7 = vector.shape_cast %6 : vector<64x32xf32> to vector<4x16x32xf32>
    %c0_7 = arith.constant 0 : index
    %c0_8 = arith.constant 0 : index
    %c0_9 = arith.constant 0 : index
    %8 = vector.load %arg3[%c0_7, %c0_8, %c0_9] : memref<2x16x16xf32, #tpu.memory_space<vmem>>, vector<2x16x16xf32>
    %c0_10 = arith.constant 0 : index
    %c0_11 = arith.constant 0 : index
    %c0_12 = arith.constant 0 : index
    %9 = vector.load %arg4[%c0_10, %c0_11, %c0_12] : memref<4x16x16xf32, #tpu.memory_space<vmem>>, vector<4x16x16xf32>
    %10 = vector.extract_strided_slice %5 {offsets = [0, 0], sizes = [64, 16], strides = [1, 1]} : vector<64x64xf32> to vector<64x16xf32>
    %11 = vector.shape_cast %10 : vector<64x16xf32> to vector<4x16x16xf32>
    %12 = vector.extract_strided_slice %5 {offsets = [0, 32], sizes = [64, 16], strides = [1, 1]} : vector<64x64xf32> to vector<64x16xf32>
    %13 = vector.shape_cast %12 : vector<64x16xf32> to vector<4x16x16xf32>
    "tpu.trace_start"() <{level = 10 : i32, message = "wnd,wmd->wnm"}> : () -> ()
    %cst_13 = arith.constant dense<0.000000e+00> : vector<4x16x16xf32>
    %14 = tpu.matmul %11, %13, %cst_13 {dimension_numbers = #tpu.dot_dimension_numbers<[2], [2], [1], [1], [0, 0, 0, 1, 1, 1], [0], [0]>} : vector<4x16x16xf32>, vector<4x16x16xf32>, vector<4x16x16xf32> -> vector<4x16x16xf32>
    "tpu.trace_stop"() : () -> ()
    %15 = vector.shape_cast %14 : vector<4x16x16xf32> to vector<1x4x16x16xf32>
    %16 = vector.extract_strided_slice %8 {offsets = [0, 0, 0], sizes = [1, 16, 16], strides = [1, 1, 1]} : vector<2x16x16xf32> to vector<1x16x16xf32>
    %17 = vector.shape_cast %16 : vector<1x16x16xf32> to vector<16x16xf32>
    %18 = vector.shape_cast %17 : vector<16x16xf32> to vector<1x16x16xf32>
    %19 = vector.broadcast %18 : vector<1x16x16xf32> to vector<4x16x16xf32>
    %20 = arith.addf %9, %19 : vector<4x16x16xf32>
    %21 = vector.shape_cast %20 : vector<4x16x16xf32> to vector<1x4x16x16xf32>
    %22 = arith.addf %15, %21 : vector<1x4x16x16xf32>
    %23 = vector.shape_cast %22 : vector<1x4x16x16xf32> to vector<4x16x16xf32>
    %cst_14 = arith.constant dense<0xFF800000> : vector<4x16xf32>
    %24 = vector.multi_reduction <maximumf>, %23, %cst_14 [2] : vector<4x16x16xf32> to vector<4x16xf32>
    %25 = vector.shape_cast %24 : vector<4x16xf32> to vector<4x16x1xf32>
    %26 = vector.broadcast %25 : vector<4x16x1xf32> to vector<4x16x16xf32>
    %27 = arith.subf %23, %26 : vector<4x16x16xf32>
    %28 = math.exp %27 : vector<4x16x16xf32>
    %cst_15 = arith.constant dense<0.000000e+00> : vector<4x16xf32>
    %29 = vector.multi_reduction <add>, %28, %cst_15 [2] : vector<4x16x16xf32> to vector<4x16xf32>
    %30 = vector.shape_cast %29 : vector<4x16xf32> to vector<4x16x1xf32>
    %31 = tpu.reciprocal %30 {approx = true} : vector<4x16x1xf32> -> vector<4x16x1xf32>
    %32 = vector.broadcast %31 : vector<4x16x1xf32> to vector<4x16x16xf32>
    %33 = arith.mulf %28, %32 : vector<4x16x16xf32>
    %34 = vector.extract_strided_slice %7 {offsets = [0, 0, 0], sizes = [4, 16, 16], strides = [1, 1, 1]} : vector<4x16x32xf32> to vector<4x16x16xf32>
    "tpu.trace_start"() <{level = 10 : i32, message = "wnm,wmd->wnd"}> : () -> ()
    %cst_16 = arith.constant dense<0.000000e+00> : vector<4x16x16xf32>
    %35 = tpu.matmul %33, %34, %cst_16 {dimension_numbers = #tpu.dot_dimension_numbers<[2], [1], [1], [2], [0, 0, 0, 1, 1, 2], [0], [0]>} : vector<4x16x16xf32>, vector<4x16x16xf32>, vector<4x16x16xf32> -> vector<4x16x16xf32>
    "tpu.trace_stop"() : () -> ()
    %36 = vector.shape_cast %35 : vector<4x16x16xf32> to vector<64x16xf32>
    %37 = vector.extract_strided_slice %5 {offsets = [0, 16], sizes = [64, 16], strides = [1, 1]} : vector<64x64xf32> to vector<64x16xf32>
    %38 = vector.shape_cast %37 : vector<64x16xf32> to vector<4x16x16xf32>
    %39 = vector.extract_strided_slice %5 {offsets = [0, 48], sizes = [64, 16], strides = [1, 1]} : vector<64x64xf32> to vector<64x16xf32>
    %40 = vector.shape_cast %39 : vector<64x16xf32> to vector<4x16x16xf32>
    "tpu.trace_start"() <{level = 10 : i32, message = "wnd,wmd->wnm"}> : () -> ()
    %cst_17 = arith.constant dense<0.000000e+00> : vector<4x16x16xf32>
    %41 = tpu.matmul %38, %40, %cst_17 {dimension_numbers = #tpu.dot_dimension_numbers<[2], [2], [1], [1], [0, 0, 0, 1, 1, 1], [0], [0]>} : vector<4x16x16xf32>, vector<4x16x16xf32>, vector<4x16x16xf32> -> vector<4x16x16xf32>
    "tpu.trace_stop"() : () -> ()
    %42 = vector.shape_cast %41 : vector<4x16x16xf32> to vector<1x4x16x16xf32>
    %43 = vector.extract_strided_slice %8 {offsets = [1, 0, 0], sizes = [1, 16, 16], strides = [1, 1, 1]} : vector<2x16x16xf32> to vector<1x16x16xf32>
    %44 = vector.shape_cast %43 : vector<1x16x16xf32> to vector<16x16xf32>
    %45 = vector.shape_cast %44 : vector<16x16xf32> to vector<1x16x16xf32>
    %46 = vector.broadcast %45 : vector<1x16x16xf32> to vector<4x16x16xf32>
    %47 = arith.addf %9, %46 : vector<4x16x16xf32>
    %48 = vector.shape_cast %47 : vector<4x16x16xf32> to vector<1x4x16x16xf32>
    %49 = arith.addf %42, %48 : vector<1x4x16x16xf32>
    %50 = vector.shape_cast %49 : vector<1x4x16x16xf32> to vector<4x16x16xf32>
    %cst_18 = arith.constant dense<0xFF800000> : vector<4x16xf32>
    %51 = vector.multi_reduction <maximumf>, %50, %cst_18 [2] : vector<4x16x16xf32> to vector<4x16xf32>
    %52 = vector.shape_cast %51 : vector<4x16xf32> to vector<4x16x1xf32>
    %53 = vector.broadcast %52 : vector<4x16x1xf32> to vector<4x16x16xf32>
    %54 = arith.subf %50, %53 : vector<4x16x16xf32>
    %55 = math.exp %54 : vector<4x16x16xf32>
    %cst_19 = arith.constant dense<0.000000e+00> : vector<4x16xf32>
    %56 = vector.multi_reduction <add>, %55, %cst_19 [2] : vector<4x16x16xf32> to vector<4x16xf32>
    %57 = vector.shape_cast %56 : vector<4x16xf32> to vector<4x16x1xf32>
    %58 = tpu.reciprocal %57 {approx = true} : vector<4x16x1xf32> -> vector<4x16x1xf32>
    %59 = vector.broadcast %58 : vector<4x16x1xf32> to vector<4x16x16xf32>
    %60 = arith.mulf %55, %59 : vector<4x16x16xf32>
    %61 = vector.extract_strided_slice %7 {offsets = [0, 0, 16], sizes = [4, 16, 16], strides = [1, 1, 1]} : vector<4x16x32xf32> to vector<4x16x16xf32>
    "tpu.trace_start"() <{level = 10 : i32, message = "wnm,wmd->wnd"}> : () -> ()
    %cst_20 = arith.constant dense<0.000000e+00> : vector<4x16x16xf32>
    %62 = tpu.matmul %60, %61, %cst_20 {dimension_numbers = #tpu.dot_dimension_numbers<[2], [1], [1], [2], [0, 0, 0, 1, 1, 2], [0], [0]>} : vector<4x16x16xf32>, vector<4x16x16xf32>, vector<4x16x16xf32> -> vector<4x16x16xf32>
    "tpu.trace_stop"() : () -> ()
    %63 = vector.shape_cast %62 : vector<4x16x16xf32> to vector<64x16xf32>
    %64 = tpu.concatenate %36, %63 in 1 : vector<64x16xf32>, vector<64x16xf32> -> vector<64x32xf32>
    %c0_21 = arith.constant 0 : index
    %c0_22 = arith.constant 0 : index
    %65 = vector.load %arg7[%c0_21, %c0_22] : memref<32x32xf32, #tpu.memory_space<vmem>>, vector<32x32xf32>
    %cst_23 = arith.constant dense<0.000000e+00> : vector<64x32xf32>
    %66 = tpu.matmul %64, %65, %cst_23 {dimension_numbers = #tpu.dot_dimension_numbers<[1], [0], [0], [1], [0, 0, 1, 1], [], []>} : vector<64x32xf32>, vector<32x32xf32>, vector<64x32xf32> -> vector<64x32xf32>
    %c0_24 = arith.constant 0 : index
    %c0_25 = arith.constant 0 : index
    %67 = vector.load %arg8[%c0_24, %c0_25] : memref<1x32xf32, #tpu.memory_space<vmem>>, vector<1x32xf32>
    %68 = vector.broadcast %67 : vector<1x32xf32> to vector<64x32xf32>
    %69 = arith.addf %66, %68 : vector<64x32xf32>
    %c0_26 = arith.constant 0 : index
    %c0_27 = arith.constant 0 : index
    %70 = vector.load %arg9[%c0_26, %c0_27] : memref<64x32xf32, #tpu.memory_space<vmem>>, vector<64x32xf32>
    tpu.vector_store %arg9[%c0_26, %c0_27], %69 {strides = array<i32>} : memref<64x32xf32, #tpu.memory_space<vmem>>, vector<64x32xf32>,
    return
  }
  func.func @transform_0(%arg0: i32) -> (i32, i32) {
    %c0_i32 = arith.constant 0 : i32
    %c0_i32_0 = arith.constant 0 : i32
    return %arg0, %c0_i32 : i32, i32
  }
  func.func @transform_1(%arg0: i32) -> (i32, i32) {
    %c0_i32 = arith.constant 0 : i32
    %c0_i32_0 = arith.constant 0 : i32
    return %arg0, %c0_i32 : i32, i32
  }
  func.func @transform_2(%arg0: i32) -> (i32, i32, i32) {
    %c0_i32 = arith.constant 0 : i32
    %c0_i32_0 = arith.constant 0 : i32
    %c0_i32_1 = arith.constant 0 : i32
    %c0_i32_2 = arith.constant 0 : i32
    return %c0_i32, %c0_i32_0, %c0_i32_1 : i32, i32, i32
  }
  func.func @transform_3(%arg0: i32) -> (i32, i32, i32) {
    %c0_i32 = arith.constant 0 : i32
    %c0_i32_0 = arith.constant 0 : i32
    %c0_i32_1 = arith.constant 0 : i32
    %c0_i32_2 = arith.constant 0 : i32
    return %c0_i32, %c0_i32_0, %c0_i32_1 : i32, i32, i32
  }
  func.func @transform_4(%arg0: i32) -> (i32, i32) {
    %c0_i32 = arith.constant 0 : i32
    %c0_i32_0 = arith.constant 0 : i32
    %c0_i32_1 = arith.constant 0 : i32
    return %c0_i32, %c0_i32_0 : i32, i32
  }
  func.func @transform_5(%arg0: i32) -> (i32, i32) {
    %c0_i32 = arith.constant 0 : i32
    %c0_i32_0 = arith.constant 0 : i32
    %c0_i32_1 = arith.constant 0 : i32
    return %c0_i32, %c0_i32_0 : i32, i32
  }
  func.func @transform_6(%arg0: i32) -> (i32, i32) {
    %c0_i32 = arith.constant 0 : i32
    %c0_i32_0 = arith.constant 0 : i32
    %c0_i32_1 = arith.constant 0 : i32
    return %c0_i32, %c0_i32_0 : i32, i32
  }
  func.func @transform_7(%arg0: i32) -> (i32, i32) {
    %c0_i32 = arith.constant 0 : i32
    %c0_i32_0 = arith.constant 0 : i32
    %c0_i32_1 = arith.constant 0 : i32
    return %c0_i32, %c0_i32_0 : i32, i32
  }
  func.func @transform_8(%arg0: i32) -> (i32, i32) {
    %c0_i32 = arith.constant 0 : i32
    %c0_i32_0 = arith.constant 0 : i32
    return %arg0, %c0_i32 : i32, i32
  }
}

module attributes {stable_mosaic.version = 11 : i64} {
  func.func @_window_attn_kernel(%arg0: i32, %arg1: memref<64x32xf32, #tpu.memory_space<vmem>>, %arg2: memref<64x32xf32, #tpu.memory_space<vmem>>, %arg3: memref<2x16x16xf32, #tpu.memory_space<vmem>>, %arg4: memref<4x16x16xf32, #tpu.memory_space<vmem>>, %arg5: memref<32x64xf32, #tpu.memory_space<vmem>>, %arg6: memref<1x64xf32, #tpu.memory_space<vmem>>, %arg7: memref<32x32xf32, #tpu.memory_space<vmem>>, %arg8: memref<1x32xf32, #tpu.memory_space<vmem>>, %arg9: memref<64x32xf32, #tpu.memory_space<vmem>>) attributes {dimension_semantics = [#tpu.dimension_semantics<parallel>], iteration_bounds = array<i64: 2>, scalar_prefetch = 0 : i64, scratch_operands = 0 : i64, tpu.core_type = #tpu.core_type<tc>, window_params = [{transform_indices = @transform_0, window_bounds = array<i64: 64, 32>}, {transform_indices = @transform_1, window_bounds = array<i64: 64, 32>}, {pipeline_mode = #tpu.pipeline_mode<synchronous>, transform_indices = @transform_2, window_bounds = array<i64: 2, 16, 16>}, {pipeline_mode = #tpu.pipeline_mode<synchronous>, transform_indices = @transform_3, window_bounds = array<i64: 4, 16, 16>}, {pipeline_mode = #tpu.pipeline_mode<synchronous>, transform_indices = @transform_4, window_bounds = array<i64: 32, 64>}, {pipeline_mode = #tpu.pipeline_mode<synchronous>, transform_indices = @transform_5, window_bounds = array<i64: 1, 64>}, {pipeline_mode = #tpu.pipeline_mode<synchronous>, transform_indices = @transform_6, window_bounds = array<i64: 32, 32>}, {pipeline_mode = #tpu.pipeline_mode<synchronous>, transform_indices = @transform_7, window_bounds = array<i64: 1, 32>}, {transform_indices = @transform_8, window_bounds = array<i64: 64, 32>}]} {
    %c0 = arith.constant 0 : index
    %c0_0 = arith.constant 0 : index
    %0 = vector.load %arg1[%c0, %c0_0] : memref<64x32xf32, #tpu.memory_space<vmem>>, vector<64x32xf32>
    %c0_1 = arith.constant 0 : index
    %c0_2 = arith.constant 0 : index
    %1 = vector.load %arg5[%c0_1, %c0_2] : memref<32x64xf32, #tpu.memory_space<vmem>>, vector<32x64xf32>
    %cst = arith.constant dense<0.000000e+00> : vector<64x64xf32>
    %2 = tpu.matmul %0, %1, %cst {dimension_numbers = #tpu.dot_dimension_numbers<[1], [0], [0], [1], [0, 0, 1, 1], [], []>} : vector<64x32xf32>, vector<32x64xf32>, vector<64x64xf32> -> vector<64x64xf32>
    %c0_3 = arith.constant 0 : index
    %c0_4 = arith.constant 0 : index
    %3 = vector.load %arg6[%c0_3, %c0_4] : memref<1x64xf32, #tpu.memory_space<vmem>>, vector<1x64xf32>
    %4 = vector.broadcast %3 : vector<1x64xf32> to vector<64x64xf32>
    %5 = arith.addf %2, %4 : vector<64x64xf32>
    %c0_5 = arith.constant 0 : index
    %c0_6 = arith.constant 0 : index
    %6 = vector.load %arg2[%c0_5, %c0_6] : memref<64x32xf32, #tpu.memory_space<vmem>>, vector<64x32xf32>
    %7 = vector.shape_cast %6 : vector<64x32xf32> to vector<4x16x32xf32>
    %c0_7 = arith.constant 0 : index
    %c0_8 = arith.constant 0 : index
    %c0_9 = arith.constant 0 : index
    %8 = vector.load %arg3[%c0_7, %c0_8, %c0_9] : memref<2x16x16xf32, #tpu.memory_space<vmem>>, vector<2x16x16xf32>
    %c0_10 = arith.constant 0 : index
    %c0_11 = arith.constant 0 : index
    %c0_12 = arith.constant 0 : index
    %9 = vector.load %arg4[%c0_10, %c0_11, %c0_12] : memref<4x16x16xf32, #tpu.memory_space<vmem>>, vector<4x16x16xf32>
    %10 = vector.extract_strided_slice %5 {offsets = [0, 0], sizes = [64, 16], strides = [1, 1]} : vector<64x64xf32> to vector<64x16xf32>
    %11 = vector.shape_cast %10 : vector<64x16xf32> to vector<4x16x16xf32>
    %12 = vector.extract_strided_slice %5 {offsets = [0, 32], sizes = [64, 16], strides = [1, 1]} : vector<64x64xf32> to vector<64x16xf32>
    %13 = vector.shape_cast %12 : vector<64x16xf32> to vector<4x16x16xf32>
    "tpu.trace_start"() <{level = 10 : i32, message = "wnd,wmd->wnm"}> : () -> ()
    %cst_13 = arith.constant dense<0.000000e+00> : vector<4x16x16xf32>
    %14 = tpu.matmul %11, %13, %cst_13 {dimension_numbers = #tpu.dot_dimension_numbers<[2], [2], [1], [1], [0, 0, 0, 1, 1, 1], [0], [0]>} : vector<4x16x16xf32>, vector<4x16x16xf32>, vector<4x16x16xf32> -> vector<4x16x16xf32>
    "tpu.trace_stop"() : () -> ()
    %15 = vector.shape_cast %14 : vector<4x16x16xf32> to vector<1x4x16x16xf32>
    %16 = vector.extract_strided_slice %8 {offsets = [0, 0, 0], sizes = [1, 16, 16], strides = [1, 1, 1]} : vector<2x16x16xf32> to vector<1x16x16xf32>
    %17 = vector.shape_cast %16 : vector<1x16x16xf32> to vector<16x16xf32>
    %18 = vector.shape_cast %17 : vector<16x16xf32> to vector<1x16x16xf32>
    %19 = vector.broadcast %18 : vector<1x16x16xf32> to vector<4x16x16xf32>
    %20 = arith.addf %9, %19 : vector<4x16x16xf32>
    %21 = vector.shape_cast %20 : vector<4x16x16xf32> to vector<1x4x16x16xf32>
    %22 = arith.addf %15, %21 : vector<1x4x16x16xf32>
    %23 = vector.shape_cast %22 : vector<1x4x16x16xf32> to vector<4x16x16xf32>
    %cst_14 = arith.constant dense<0xFF800000> : vector<4x16xf32>
    %24 = vector.multi_reduction <maximumf>, %23, %cst_14 [2] : vector<4x16x16xf32> to vector<4x16xf32>
    %25 = vector.shape_cast %24 : vector<4x16xf32> to vector<4x16x1xf32>
    %26 = vector.broadcast %25 : vector<4x16x1xf32> to vector<4x16x16xf32>
    %27 = arith.subf %23, %26 : vector<4x16x16xf32>
    %28 = math.exp %27 : vector<4x16x16xf32>
    %cst_15 = arith.constant dense<0.000000e+00> : vector<4x16xf32>
    %29 = vector.multi_reduction <add>, %28, %cst_15 [2] : vector<4x16x16xf32> to vector<4x16xf32>
    %30 = vector.shape_cast %29 : vector<4x16xf32> to vector<4x16x1xf32>
    %31 = tpu.reciprocal %30 {approx = true} : vector<4x16x1xf32> -> vector<4x16x1xf32>
    %32 = vector.broadcast %31 : vector<4x16x1xf32> to vector<4x16x16xf32>
    %33 = arith.mulf %28, %32 : vector<4x16x16xf32>
    %34 = vector.extract_strided_slice %7 {offsets = [0, 0, 0], sizes = [4, 16, 16], strides = [1, 1, 1]} : vector<4x16x32xf32> to vector<4x16x16xf32>
    "tpu.trace_start"() <{level = 10 : i32, message = "wnm,wmd->wnd"}> : () -> ()
    %cst_16 = arith.constant dense<0.000000e+00> : vector<4x16x16xf32>
    %35 = tpu.matmul %33, %34, %cst_16 {dimension_numbers = #tpu.dot_dimension_numbers<[2], [1], [1], [2], [0, 0, 0, 1, 1, 2], [0], [0]>} : vector<4x16x16xf32>, vector<4x16x16xf32>, vector<4x16x16xf32> -> vector<4x16x16xf32>
    "tpu.trace_stop"() : () -> ()
    %36 = vector.shape_cast %35 : vector<4x16x16xf32> to vector<64x16xf32>
    %37 = vector.extract_strided_slice %5 {offsets = [0, 16], sizes = [64, 16], strides = [1, 1]} : vector<64x64xf32> to vector<64x16xf32>
    %38 = vector.shape_cast %37 : vector<64x16xf32> to vector<4x16x16xf32>
    %39 = vector.extract_strided_slice %5 {offsets = [0, 48], sizes = [64, 16], strides = [1, 1]} : vector<64x64xf32> to vector<64x16xf32>
    %40 = vector.shape_cast %39 : vector<64x16xf32> to vector<4x16x16xf32>
    "tpu.trace_start"() <{level = 10 : i32, message = "wnd,wmd->wnm"}> : () -> ()
    %cst_17 = arith.constant dense<0.000000e+00> : vector<4x16x16xf32>
    %41 = tpu.matmul %38, %40, %cst_17 {dimension_numbers = #tpu.dot_dimension_numbers<[2], [2], [1], [1], [0, 0, 0, 1, 1, 1], [0], [0]>} : vector<4x16x16xf32>, vector<4x16x16xf32>, vector<4x16x16xf32> -> vector<4x16x16xf32>
    "tpu.trace_stop"() : () -> ()
    %42 = vector.shape_cast %41 : vector<4x16x16xf32> to vector<1x4x16x16xf32>
    %43 = vector.extract_strided_slice %8 {offsets = [1, 0, 0], sizes = [1, 16, 16], strides = [1, 1, 1]} : vector<2x16x16xf32> to vector<1x16x16xf32>
    %44 = vector.shape_cast %43 : vector<1x16x16xf32> to vector<16x16xf32>
    %45 = vector.shape_cast %44 : vector<16x16xf32> to vector<1x16x16xf32>
    %46 = vector.broadcast %45 : vector<1x16x16xf32> to vector<4x16x16xf32>
    %47 = arith.addf %9, %46 : vector<4x16x16xf32>
    %48 = vector.shape_cast %47 : vector<4x16x16xf32> to vector<1x4x16x16xf32>
    %49 = arith.addf %42, %48 : vector<1x4x16x16xf32>
    %50 = vector.shape_cast %49 : vector<1x4x16x16xf32> to vector<4x16x16xf32>
    %cst_18 = arith.constant dense<0xFF800000> : vector<4x16xf32>
    %51 = vector.multi_reduction <maximumf>, %50, %cst_18 [2] : vector<4x16x16xf32> to vector<4x16xf32>
    %52 = vector.shape_cast %51 : vector<4x16xf32> to vector<4x16x1xf32>
    %53 = vector.broadcast %52 : vector<4x16x1xf32> to vector<4x16x16xf32>
    %54 = arith.subf %50, %53 : vector<4x16x16xf32>
    %55 = math.exp %54 : vector<4x16x16xf32>
    %cst_19 = arith.constant dense<0.000000e+00> : vector<4x16xf32>
    %56 = vector.multi_reduction <add>, %55, %cst_19 [2] : vector<4x16x16xf32> to vector<4x16xf32>
    %57 = vector.shape_cast %56 : vector<4x16xf32> to vector<4x16x1xf32>
    %58 = tpu.reciprocal %57 {approx = true} : vector<4x16x1xf32> -> vector<4x16x1xf32>
    %59 = vector.broadcast %58 : vector<4x16x1xf32> to vector<4x16x16xf32>
    %60 = arith.mulf %55, %59 : vector<4x16x16xf32>
    %61 = vector.extract_strided_slice %7 {offsets = [0, 0, 16], sizes = [4, 16, 16], strides = [1, 1, 1]} : vector<4x16x32xf32> to vector<4x16x16xf32>
    "tpu.trace_start"() <{level = 10 : i32, message = "wnm,wmd->wnd"}> : () -> ()
    %cst_20 = arith.constant dense<0.000000e+00> : vector<4x16x16xf32>
    %62 = tpu.matmul %60, %61, %cst_20 {dimension_numbers = #tpu.dot_dimension_numbers<[2], [1], [1], [2], [0, 0, 0, 1, 1, 2], [0], [0]>} : vector<4x16x16xf32>, vector<4x16x16xf32>, vector<4x16x16xf32> -> vector<4x16x16xf32>
    "tpu.trace_stop"() : () -> ()
    %63 = vector.shape_cast %62 : vector<4x16x16xf32> to vector<64x16xf32>
    %64 = tpu.concatenate %36, %63 in 1 : vector<64x16xf32>, vector<64x16xf32> -> vector<64x32xf32>
    %c0_21 = arith.constant 0 : index
    %c0_22 = arith.constant 0 : index
    %65 = vector.load %arg7[%c0_21, %c0_22] : memref<32x32xf32, #tpu.memory_space<vmem>>, vector<32x32xf32>
    %cst_23 = arith.constant dense<0.000000e+00> : vector<64x32xf32>
    %66 = tpu.matmul %64, %65, %cst_23 {dimension_numbers = #tpu.dot_dimension_numbers<[1], [0], [0], [1], [0, 0, 1, 1], [], []>} : vector<64x32xf32>, vector<32x32xf32>, vector<64x32xf32> -> vector<64x32xf32>
    %c0_24 = arith.constant 0 : index
    %c0_25 = arith.constant 0 : index
    %67 = vector.load %arg8[%c0_24, %c0_25] : memref<1x32xf32, #tpu.memory_space<vmem>>, vector<1x32xf32>
    %68 = vector.broadcast %67 : vector<1x32xf32> to vector<64x32xf32>
    %69 = arith.addf %66, %68 : vector<64x32xf32>
    %c0_26 = arith.constant 0 : index
    %c0_27 = arith.constant 0 : index
    %70 = vector.load %arg9[%c0_26, %c0_27] : memref<64x32xf32, #tpu.memory_space<vmem>>, vector<64x32xf32>
    tpu.vector_store %arg9[%c0_26, %c0_27], %69 {strides = array<i32>} : memref<64x32xf32, #tpu.memory_space<vmem>>, vector<64x32xf32>,
    return
  }
  func.func @transform_0(%arg0: i32) -> (i32, i32) {
    %c0_i32 = arith.constant 0 : i32
    %c0_i32_0 = arith.constant 0 : i32
    return %arg0, %c0_i32 : i32, i32
  }
  func.func @transform_1(%arg0: i32) -> (i32, i32) {
    %c0_i32 = arith.constant 0 : i32
    %c0_i32_0 = arith.constant 0 : i32
    return %arg0, %c0_i32 : i32, i32
  }
  func.func @transform_2(%arg0: i32) -> (i32, i32, i32) {
    %c0_i32 = arith.constant 0 : i32
    %c0_i32_0 = arith.constant 0 : i32
    %c0_i32_1 = arith.constant 0 : i32
    %c0_i32_2 = arith.constant 0 : i32
    return %c0_i32, %c0_i32_0, %c0_i32_1 : i32, i32, i32
  }
  func.func @transform_3(%arg0: i32) -> (i32, i32, i32) {
    %c0_i32 = arith.constant 0 : i32
    %c0_i32_0 = arith.constant 0 : i32
    %c0_i32_1 = arith.constant 0 : i32
    %c0_i32_2 = arith.constant 0 : i32
    return %c0_i32, %c0_i32_0, %c0_i32_1 : i32, i32, i32
  }
  func.func @transform_4(%arg0: i32) -> (i32, i32) {
    %c0_i32 = arith.constant 0 : i32
    %c0_i32_0 = arith.constant 0 : i32
    %c0_i32_1 = arith.constant 0 : i32
    return %c0_i32, %c0_i32_0 : i32, i32
  }
  func.func @transform_5(%arg0: i32) -> (i32, i32) {
    %c0_i32 = arith.constant 0 : i32
    %c0_i32_0 = arith.constant 0 : i32
    %c0_i32_1 = arith.constant 0 : i32
    return %c0_i32, %c0_i32_0 : i32, i32
  }
  func.func @transform_6(%arg0: i32) -> (i32, i32) {
    %c0_i32 = arith.constant 0 : i32
    %c0_i32_0 = arith.constant 0 : i32
    %c0_i32_1 = arith.constant 0 : i32
    return %c0_i32, %c0_i32_0 : i32, i32
  }
  func.func @transform_7(%arg0: i32) -> (i32, i32) {
    %c0_i32 = arith.constant 0 : i32
    %c0_i32_0 = arith.constant 0 : i32
    %c0_i32_1 = arith.constant 0 : i32
    return %c0_i32, %c0_i32_0 : i32, i32
  }
  func.func @transform_8(%arg0: i32) -> (i32, i32) {
    %c0_i32 = arith.constant 0 : i32
    %c0_i32_0 = arith.constant 0 : i32
    return %arg0, %c0_i32 : i32, i32
  }
}

</mosaic_0001>

<bundles_post_ra>
// kernel: tpu_custom_call.1
= control target key start
LH: loop header
LB: loop body
LE: loop exit
PB: predicated region body
PF: predicated region fallthrough
CT: control target
= control target key end

     0   :  { %s2825_s27 = smov 0   ;;  %s3285_s0 = inlined_call_operand.vmem [shape: f32[128,32], index: 0, kind: input, shape index: {}]   ;;  %s3286_s1 = inlined_call_operand.vmem [shape: f32[128,32], index: 1, kind: input, shape index: {}]   ;;  %s3287_s2 = inlined_call_operand.vmem [shape: f32[2,16,16], index: 2, kind: input, shape index: {}]   ;;  %s3288_s3 = inlined_call_operand.vmem [shape: f32[4,16,16], index: 3, kind: input, shape index: {}]   ;;  %s3289_s4 = inlined_call_operand.vmem [shape: f32[32,64], index: 4, kind: input, shape index: {}]   ;;  %s3290_s5 = inlined_call_operand.vmem [shape: f32[1,64], index: 5, kind: input, shape index: {}]   ;;  %s3291_s6 = inlined_call_operand.vmem [shape: f32[32,32], index: 6, kind: input, shape index: {}]   ;;  %s3292_s7 = inlined_call_operand.vmem [shape: f32[1,32], index: 7, kind: input, shape index: {}]   ;;  %s3293_s8 = inlined_call_operand.vmem [shape: f32[128,32], index: 8, kind: output, shape index: {}]  }
   0x1 LB: > { %s2365_s28 = sadd.s32 4294967295, %s2774_s27   ;;  %p2369_p0 = scmp.ge.s32.totalorder %s2774_s27, 1  ;;  %s2774_s27 = sphi %s2825_s27, %s18_s27  }
   0x2   : > { %p274_p1 = scmp.lt.s32.totalorder %s2774_s27, 3 }
   0x4   : > { %p275_p2 = pnand %p2369_p0, %p274_p1 }
   0x5   : > { %s2370_s11 = sshll.u32 (!%p275_p2), %s2365_s28, 3  ;;  %s2776_s22 = smov (!%p275_p2), 96  }
   0x6   : > { %278 = sbr.rel (%p275_p2) target bundleno = 1966 (0x7ae), region = 52  ;;  %p314_p3 = scmp.lt.s32.totalorder (!%p275_p2), %s2370_s11, 15 }
   0x7   : > { %s2777_s21 = smov (!%p275_p2), 80   ;;  %s2779_s20 = smov (!%p275_p2), 16  }
   0xb   : > { %v342_v0 = vld [vmem:[%s3289_s4 + $0x18] sm:$0xff]  ;;  %v341_v1 = vld [vmem:[%s3289_s4 + $0x10] sm:$0xff]  ;;  %v340_v2 = vld [vmem:[%s3289_s4 + $0x8] sm:$0xff]  ;;  %s3295_s11 = smov (!%p314_p3, %s2370_s11), 15  ;;  %vm350_vm0 = vcmask 261120   ;;  %vm506_vm1 = vcmask 130048  }
   0xc   : > { %2532 = vmatprep.subr.mxu0 %v342_v0  ;;  %2684 = vmatprep.subr.mxu1 %v342_v0  ;;  %v339_v3 = vld [vmem:[%s3289_s4] sm:$0xff]  ;;  %s2845_s16 = sshll.u32 %s3295_s11, 3  ;;  %v489_v37 = vld [vmem:[%s3287_s2 + $0x8] sm:$0xff]  ;;  %v2939_v46 = vld [vmem:[%s3288_s3 + $0x18] sm:$0xff] }
   0xd   : > { %2533 = vmatpush3.msra.mxu0 %v342_v0  ;;  %2688 = vmatpush3.msra.mxu1 %v342_v0  ;;  %s317_s19 = scalar_lea.vmem %s3285_s0, %s2845_s16  ;;  %v2376_v12 = vld [vmem:[%s3290_s5] ss:$0 sm:$0xff]  ;;  %v2924_v38 = vld [vmem:[%s3288_s3 + $0x8] sm:$0xff]  ;;  %v860_v50 = vadd.f32 %v2939_v46, %v489_v37  ;;  %v2952_v52 = vld [vmem:[%s3288_s3 + $0x10] sm:$0xff]  ;;  %s3029_s28 = scalar_lea.vmem %s3286_s1, %s2845_s16 }
   0xe   : > { %2534 = vmatprep.subr.mxu0 %v341_v1  ;;  %2685 = vmatprep.subr.mxu1 %v341_v1  ;;  %v331_v4 = vld [vmem:[%s317_s19] sm:$0xff]  ;;  %v332_v5 = vld [vmem:[%s317_s19 + $0x8] sm:$0xff]  ;;  %v333_v6 = vld [vmem:[%s317_s19 + $0x10] sm:$0xff]  ;;  %v858_v41 = vadd.f32 %v2924_v38, %v489_v37  ;;  %s329_s25 = scalar_lea.vmem %s3293_s8, %s2845_s16 }
   0xf   : > { %2535 = vmatpush3.msra.mxu0 %v341_v1  ;;  %2689 = vmatpush3.msra.mxu1 %v341_v1  ;;  %v335_v7 = vld [vmem:[%s317_s19 + $0x20] sm:$0xff]  ;;  %v336_v8 = vld [vmem:[%s317_s19 + $0x28] sm:$0xff]  ;;  %v337_v9 = vld [vmem:[%s317_s19 + $0x30] sm:$0xff] }
  0x10   : > { %2536 = vmatprep.subr.mxu0 %v340_v2  ;;  %2686 = vmatprep.subr.mxu1 %v340_v2  ;;  %v334_v10 = vld [vmem:[%s317_s19 + $0x18] sm:$0xff]  ;;  %v488_v39 = vld [vmem:[%s3287_s2] sm:$0xff]  ;;  %v2959_v58 = vld [vmem:[%s3288_s3 + $0x28] sm:$0xff] }
  0x11   : > { %2537 = vmatpush3.msra.mxu0 %v340_v2  ;;  %2690 = vmatpush3.msra.mxu1 %v340_v2  ;;  %v338_v11 = vld [vmem:[%s317_s19 + $0x38] sm:$0xff]  ;;  %v2932_v40 = vld [vmem:[%s3288_s3] sm:$0xff]  ;;  %v859_v57 = vadd.f32 %v2952_v52, %v488_v39  ;;  %v862_v63 = vadd.f32 %v2959_v58, %v489_v37 }
  0x12   : > { %2538 = vmatprep.subr.mxu0 %v339_v3  ;;  %2687 = vmatprep.subr.mxu1 %v339_v3  ;;  %v857_v42 = vadd.f32 %v2932_v40, %v488_v39  ;;  %v2947_v51 = vld [vmem:[%s3288_s3 + $0x20] sm:$0xff]  ;;  %v2967_v2 = vld [vmem:[%s3288_s3 + $0x38] sm:$0xff] }
  0x13   : > { %2539 = vmatpush3.msra.mxu0 %v339_v3  ;;  %2540 = vmatprep.mubr.msk.f32.mxu0 %vm350_vm0, %v331_v4  ;;  %v861_v54 = vadd.f32 %v2947_v51, %v488_v39  ;;  %v864_v4 = vadd.f32 %v2967_v2, %v489_v37 }
  0x14   : > { %2541 = vmatmul.mubr.msk.f32.vlgmr.msra.gmra.mxu0 %vm350_vm0, %v332_v5  ;;  %2691 = vmatpush3.msra.mxu1 %v339_v3 }
  0x15   : > { %2543 = vmatprep.mubr.msk.f32.mxu0 %vm350_vm0, %v333_v6  ;;  %2546 = vmatprep.mubr.msk.f32.mxu1 %vm350_vm0, %v335_v7 }
  0x16   : > { %2547 = vmatmul.mubr.msk.f32.vlgmr.msra.gmra.mxu1 %vm350_vm0, %v336_v8 }
  0x17   : > { %2549 = vmatprep.mubr.msk.f32.mxu1 %vm350_vm0, %v337_v9 }
  0x18   : > { %2544 = vmatmul.mubr.msk.f32.gmra.mxu0 %vm350_vm0, %v334_v10  ;;  %v2990_v10 = vld [vmem:[%s3288_s3 + $0x30] sm:$0xff] }
  0x1a   : > { %2550 = vmatmul.mubr.msk.f32.gmra.mxu1 %vm350_vm0, %v338_v11  ;;  %v863_v11 = vadd.f32 %v2990_v10, %v488_v39 }
  0xd4   : > { %v2542_v13 = vpop.f32.mrf.mxu0 }
  0xd5   : > { %v2862_v14 = vadd.f32 %v2542_v13, %v2376_v12 }
  0xd6   : > { %v441_v15 = vpop.f32.mrf.mxu0  ;;  %v2548_v16 = vpop.f32.mrf.mxu1 }
  0xd7   : > { %v2864_v17 = vadd.f32 %v2376_v12, %v441_v15  ;;  %504 = vrot.lane.b32.xlu0 %v2862_v14, %s2776_s22  ;;  %v2877_v24 = vadd.f32 %v2548_v16, %v2376_v12 }
  0xd8   : > { %v2545_v18 = vpop.f32.mrf.mxu0  ;;  %v461_v19 = vpop.f32.mrf.mxu1 }
  0xd9   : > { %v2867_v20 = vadd.f32 %v2545_v18, %v2376_v12  ;;  %2556 = vmatprep.mubr.msk.f32.mxu1 %vm506_vm1, %v2864_v17  ;;  %v2871_v22 = vadd.f32 %v2376_v12, %v461_v19 }
  0xda   : > { %v451_v21 = vpop.f32.mrf.mxu0  ;;  %v2551_v25 = vpop.f32.mrf.mxu1 }
  0xdb   : > { %594 = vrot.lane.b32.xlu1 %v2867_v20, %s2776_s22  ;;  %502 = vrot.lane.b32.xlu0 %v2864_v17, %s2776_s22  ;;  %v2875_v23 = vadd.f32 %v2376_v12, %v451_v21  ;;  %v2883_v26 = vadd.f32 %v2551_v25, %v2376_v12 }
  0xdc   : > { %2570 = vmatprep.mubr.msk.f32.mxu0 %vm506_vm1, %v2871_v22  ;;  %v471_v27 = vpop.f32.mrf.mxu1 }
  0xdd   : > { %v2887_v28 = vadd.f32 %v2376_v12, %v471_v27 }
  0xdf   : > { %592 = vrot.lane.b32.xlu1 %v2875_v23, %s2776_s22  ;;  %683 = vrot.lane.b32.xlu0 %v2877_v24, %s2776_s22 }
  0xe3   : > { %681 = vrot.lane.b32.xlu1 %v2871_v22, %s2776_s22  ;;  %772 = vrot.lane.b32.xlu0 %v2883_v26, %s2776_s22 }
  0xe7   : > { %770 = vrot.lane.b32.xlu1 %v2887_v28, %s2776_s22  ;;  %s2778_s22 = smov 112  }
 0x149   : > { %v505_v29 = vpop.permute.xlu0 %504 }
 0x14a   : > { %2552 = vmatprep.subr.msk.mxu1 %vm506_vm1, %v505_v29 }
 0x14b   : > { %2553 = vmatpush3.xpose.msk.msra.mxu1 %vm506_vm1, %v505_v29 }
 0x14d   : > { %v595_v30 = vpop.permute.xlu1 %594  ;;  %v503_v31 = vpop.permute.xlu0 %502 }
 0x14e   : > { %2554 = vmatprep.subr.msk.mxu1 %vm506_vm1, %v503_v31 }
 0x14f   : > { %2555 = vmatpush3.xpose.msk.msra.mxu1 %vm506_vm1, %v503_v31 }
 0x150   : > { %2559 = vmatprep.subr.msk.mxu1 %vm506_vm1, %v595_v30 }
 0x151   : > { %v593_v32 = vpop.permute.xlu1 %592  ;;  %v684_v33 = vpop.permute.xlu0 %683 }
 0x152   : > { %2557 = vmatmul.mubr.msk.f32.vlgmr.msra.gmra.mxu1 %vm506_vm1, %v2862_v14  ;;  %2566 = vmatprep.subr.msk.mxu0 %vm506_vm1, %v684_v33 }
 0x153   : > { %2560 = vmatpush3.xpose.msk.msra.mxu1 %vm506_vm1, %v595_v30  ;;  %2563 = vmatprep.mubr.msk.f32.mxu1 %vm506_vm1, %v2875_v23 }
 0x154   : > { %2567 = vmatpush3.xpose.msk.msra.mxu0 %vm506_vm1, %v684_v33  ;;  %2561 = vmatprep.subr.msk.mxu1 %vm506_vm1, %v593_v32 }
 0x155   : > { %v682_v34 = vpop.permute.xlu1 %681  ;;  %v773_v35 = vpop.permute.xlu0 %772 }
 0x156   : > { %2568 = vmatprep.subr.msk.mxu0 %vm506_vm1, %v682_v34 }
 0x157   : > { %2562 = vmatpush3.xpose.msk.msra.mxu1 %vm506_vm1, %v593_v32 }
 0x158   : > { %2569 = vmatpush3.xpose.msk.msra.mxu0 %vm506_vm1, %v682_v34  ;;  %2573 = vmatprep.subr.msk.mxu1 %vm506_vm1, %v773_v35 }
 0x159   : > { %v771_v36 = vpop.permute.xlu1 %770 }
 0x15a   : > { %2564 = vmatmul.mubr.msk.f32.vlgmr.msra.gmra.mxu1 %vm506_vm1, %v2867_v20 }
 0x15b   : > { %2571 = vmatmul.mubr.msk.f32.vlgmr.msra.gmra.mxu0 %vm506_vm1, %v2877_v24  ;;  %2574 = vmatpush3.xpose.msk.msra.mxu1 %vm506_vm1, %v773_v35 }
 0x15c   : > { %2577 = vmatprep.mubr.msk.f32.mxu1 %vm506_vm1, %v2887_v28  ;;  %2575 = vmatprep.subr.msk.mxu1 %vm506_vm1, %v771_v36 }
 0x15f   : > { %2576 = vmatpush3.xpose.msk.msra.mxu1 %vm506_vm1, %v771_v36 }
 0x162   : > { %2578 = vmatmul.mubr.msk.f32.vlgmr.msra.gmra.mxu1 %vm506_vm1, %v2883_v26 }
 0x212   : > { %v2558_v43 = vpop.f32.mrf.mxu1 }
 0x213   : > { %v866_v44 = vadd.f32 %v2558_v43, %v858_v41 }
 0x214   : > { %v581_v45 = vpop.f32.mrf.mxu1 }
 0x215   : > { %v865_v47 = vadd.f32 %v857_v42, %v581_v45  ;;  %v876_v48 = vsel %vm506_vm1, %v866_v44, -inf }
 0x216   : > { %877 = vmax.xlane.f32.xlu1 %v876_v48 }
 0x217   : > { %v873_v49 = vsel %vm506_vm1, %v865_v47, -inf }
 0x218   : > { %874 = vmax.xlane.f32.xlu0 %v873_v49 }
 0x21a   : > { %v2565_v53 = vpop.f32.mrf.mxu1 }
 0x21b   : > { %v868_v55 = vadd.f32 %v2565_v53, %v860_v50  ;;  %v2572_v56 = vpop.f32.mrf.mxu0 }
 0x21c   : > { %v670_v59 = vpop.f32.mrf.mxu1  ;;  %v870_v3 = vadd.f32 %v2572_v56, %v862_v63  ;;  %v3044_v63 = vld [vmem:[%s3029_s28 + $0x28] sm:$0xff] }
 0x21d   : > { %v759_v60 = vpop.f32.mrf.mxu0  ;;  %v882_v61 = vsel %vm506_vm1, %v868_v55, -inf  ;;  %v867_v0 = vadd.f32 %v859_v57, %v670_v59 }
 0x21e   : > { %v869_v62 = vadd.f32 %v861_v54, %v759_v60  ;;  %883 = vmax.xlane.f32.xlu1 %v882_v61  ;;  %v888_v8 = vsel %vm506_vm1, %v870_v3, -inf  ;;  %v3032_v60 = vld [vmem:[%s3029_s28 + $0x8] sm:$0xff]  ;;  %v3036_v61 = vld [vmem:[%s3029_s28] sm:$0xff] }
 0x21f   : > { %v879_v5 = vsel %vm506_vm1, %v867_v0, -inf  ;;  %2580 = vmatprep.subr.mxu0 %v3032_v60 }
 0x220   : > { %v885_v1 = vsel %vm506_vm1, %v869_v62, -inf  ;;  %2581 = vmatpush3.msra.mxu0 %v3032_v60 }
 0x221   : > { %886 = vmax.xlane.f32.xlu0 %v885_v1  ;;  %2582 = vmatprep.subr.mxu0 %v3036_v61  ;;  %v3052_v1 = vld [vmem:[%s3029_s28 + $0x18] sm:$0xff] }
 0x222   : > { %v2579_v6 = vpop.f32.mrf.mxu1  ;;  %2583 = vmatpush3.msra.mxu0 %v3036_v61  ;;  %2587 = vmatprep.subr.mxu1 %v3052_v1 }
 0x223   : > { %v872_v7 = vadd.f32 %v2579_v6, %v864_v4  ;;  %2594 = vmatprep.subr.mxu0 %v3044_v63  ;;  %v3058_v4 = vld [vmem:[%s3029_s28 + $0x10] sm:$0xff]  ;;  %2588 = vmatpush3.msra.mxu1 %v3052_v1 }
 0x224   : > { %v848_v12 = vpop.f32.mrf.mxu1  ;;  %2589 = vmatprep.subr.mxu1 %v3058_v4 }
 0x225   : > { %880 = vmax.xlane.f32.xlu0 %v879_v5  ;;  %v894_v9 = vsel %vm506_vm1, %v872_v7, -inf  ;;  %v2993_v13 = vadd.f32 %v863_v11, %v848_v12  ;;  %2590 = vmatpush3.msra.mxu1 %v3058_v4  ;;  %v3064_v5 = vld [vmem:[%s3029_s28 + $0x38] sm:$0xff] }
 0x226   : > { %2601 = vmatprep.subr.mxu1 %v3064_v5 }
 0x227   : > { %v891_v15 = vsel %vm506_vm1, %v2993_v13, -inf }
 0x229   : > { %889 = vmax.xlane.f32.xlu0 %v888_v8 }
 0x22d   : > { %895 = vmax.xlane.f32.xlu0 %v894_v9 }
 0x22f   : > { %1291 = vrot.lane.b32.xlu1 %v2862_v14, %s2777_s21 }
 0x233   : > { %1382 = vrot.lane.b32.xlu1 %v2867_v20, %s2777_s21 }
 0x237   : > { %1285 = vrot.lane.b32.xlu1 %v2864_v17, %s2778_s22 }
 0x23b   : > { %1380 = vrot.lane.b32.xlu1 %v2875_v23, %s2777_s21 }
 0x243   : > { %1289 = vrot.lane.b32.xlu0 %v2864_v17, %s2777_s21 }
 0x247   : > { %1287 = vrot.lane.b32.xlu0 %v2862_v14, %s2778_s22 }
 0x24b   : > { %1473 = vrot.lane.b32.xlu0 %v2877_v24, %s2777_s21 }
 0x25f   : > { %892 = vmax.xlane.f32.xlu1 %v891_v15 }
 0x270   : > { %1376 = vrot.lane.b32.xlu1 %v2875_v23, %s2778_s22 }
 0x29f   : > { %v878_v14 = vpop.xlane.xlu1 %877 }
 0x2a0   : > { %v898_v16 = vsub.f32 %v866_v44, %v878_v14 }
 0x2a1   : > { %v875_v17 = vpop.xlane.xlu0 %874 }
 0x2a2   : > { %v907_v18 = vmul.f32 1.442695, %v898_v16  ;;  %v897_v19 = vsub.f32 %v865_v47, %v875_v17 }
 0x2a4   : > { %2704 = vpow2.f32 %v907_v18  ;;  %v905_v21 = vmul.f32 1.442695, %v897_v19 }
 0x2a6   : > { %2706 = vpow2.f32 %v905_v21 }
 0x2a7   : > { %v884_v25 = vpop.xlane.xlu1 %883 }
 0x2a8   : > { %v900_v27 = vsub.f32 %v868_v55, %v884_v25 }
 0x2aa   : > { %v911_v29 = vmul.f32 1.442695, %v900_v27  ;;  %v887_v30 = vpop.xlane.xlu0 %886  ;;  %v3094_v27 = vld [vmem:[%s3029_s28 + $0x20] sm:$0xff] }
 0x2ab   : > { %v901_v34 = vsub.f32 %v869_v62, %v887_v30 }
 0x2ac   : > { %2708 = vpow2.f32 %v911_v29 }
 0x2ad   : > { %v913_v42 = vmul.f32 1.442695, %v901_v34  ;;  %v3106_v34 = vld [vmem:[%s3029_s28 + $0x30] sm:$0xff] }
 0x2ae   : > { %v881_v31 = vpop.xlane.xlu0 %880 }
 0x2af   : > { %v899_v32 = vsub.f32 %v867_v0, %v881_v31  ;;  %v3047_v0 = vpop.permute.xlu1 %1291 }
 0x2b1   : > { %v2999_v33 = vpop.eup %2704  ;;  %v909_v35 = vmul.f32 1.442695, %v899_v32 }
 0x2b2   : > { %v890_v23 = vpop.xlane.xlu0 %889  ;;  %v924_v36 = vsel %vm506_vm1, %v2999_v33, 0.0 }
 0x2b3   : > { %v3003_v37 = vpop.eup %2706  ;;  %2710 = vpow2.f32 %v909_v35  ;;  %v902_v39 = vsub.f32 %v870_v3, %v890_v23  ;;  %925 = vadd.xlane.f32.xlu0 %v924_v36  ;;  %v3054_v3 = vpop.permute.xlu1 %1382 }
 0x2b4   : > { %v921_v41 = vsel %vm506_vm1, %v3003_v37, 0.0 }
 0x2b5   : > { %v915_v43 = vmul.f32 1.442695, %v902_v39  ;;  %922 = vadd.xlane.f32.xlu1 %v921_v41 }
 0x2b6   : > { %v896_v44 = vpop.xlane.xlu0 %895 }
 0x2b7   : > { %2712 = vpow2.f32 %v915_v43  ;;  %v904_v45 = vsub.f32 %v872_v7, %v896_v44  ;;  %v1286_v6 = vpop.permute.xlu1 %1285 }
 0x2b8   : > { %2714 = vpow2.f32 %v913_v42 }
 0x2b9   : > { %v3007_v47 = vpop.eup %2708  ;;  %v919_v48 = vmul.f32 1.442695, %v904_v45 }
 0x2ba   : > { %v930_v49 = vsel %vm506_vm1, %v3007_v47, 0.0 }
 0x2bb   : > { %931 = vadd.xlane.f32.xlu1 %v930_v49  ;;  %2716 = vpow2.f32 %v919_v48  ;;  %v3067_v7 = vpop.permute.xlu1 %1380 }
 0x2c0   : > { %v3011_v50 = vpop.eup %2710 }
 0x2c1   : > { %v927_v53 = vsel %vm506_vm1, %v3011_v50, 0.0 }
 0x2c2   : > { %928 = vadd.xlane.f32.xlu1 %v927_v53 }
 0x2c4   : > { %v3015_v54 = vpop.eup %2712 }
 0x2c5   : > { %v936_v55 = vsel %vm506_vm1, %v3015_v54, 0.0  ;;  %v3019_v56 = vpop.eup %2714 }
 0x2c6   : > { %937 = vadd.xlane.f32.xlu0 %v936_v55  ;;  %v933_v57 = vsel %vm506_vm1, %v3019_v56, 0.0 }
 0x2c8   : > { %v3023_v59 = vpop.eup %2716 }
 0x2c9   : > { %v942_v62 = vsel %vm506_vm1, %v3023_v59, 0.0 }
 0x2ca   : > { %934 = vadd.xlane.f32.xlu0 %v933_v57 }
 0x2ce   : > { %943 = vadd.xlane.f32.xlu0 %v942_v62 }
 0x2d3   : > { %1471 = vrot.lane.b32.xlu1 %v2871_v22, %s2777_s21 }
 0x2e4   : > { %1378 = vrot.lane.b32.xlu0 %v2867_v20, %s2778_s22  ;;  %v1290_v20 = vpop.permute.xlu0 %1289 }
 0x2e8   : > { %1564 = vrot.lane.b32.xlu0 %v2883_v26, %s2777_s21  ;;  %v893_v8 = vpop.xlane.xlu1 %892 }
 0x2e9   : > { %v903_v9 = vsub.f32 %v2993_v13, %v893_v8 }
 0x2eb   : > { %v917_v11 = vmul.f32 1.442695, %v903_v9 }
 0x2ec   : > { %1469 = vrot.lane.b32.xlu0 %v2877_v24, %s2778_s22  ;;  %v1288_v24 = vpop.permute.xlu0 %1287  ;;  %v3088_v14 = vpop.permute.xlu1 %1376 }
 0x2ed   : > { %2718 = vpow2.f32 %v917_v11 }
 0x2f0   : > { %1558 = vrot.lane.b32.xlu0 %v2887_v28, %s2778_s22  ;;  %v1474_v13 = vpop.permute.xlu0 %1473 }
 0x2fa   : > { %v3078_v12 = vpop.eup %2718 }
 0x2fb   : > { %v939_v15 = vsel %vm506_vm1, %v3078_v12, 0.0 }
 0x2fc   : > { %940 = vadd.xlane.f32.xlu1 %v939_v15 }
 0x30d   : > { %1467 = vrot.lane.b32.xlu1 %v2871_v22, %s2778_s22 }
 0x311   : > { %1562 = vrot.lane.b32.xlu1 %v2887_v28, %s2777_s21 }
 0x315   : > { %1560 = vrot.lane.b32.xlu1 %v2883_v26, %s2778_s22 }
 0x33c   : > { %v926_v16 = vpop.xlane.xlu0 %925 }
 0x33d   : > { %2720 = vrcp.f32 %v926_v16 }
 0x33e   : > { %v923_v17 = vpop.xlane.xlu1 %922 }
 0x33f   : > { %2722 = vrcp.f32 %v923_v17 }
 0x344   : > { %v932_v18 = vpop.xlane.xlu1 %931 }
 0x345   : > { %2724 = vrcp.f32 %v932_v18 }
 0x34a   : > { %v2721_v19 = vpop.eup %2720 }
 0x34b   : > { %v929_v22 = vpop.xlane.xlu1 %928  ;;  %v954_v26 = vmul.f32 %v2721_v19, %v2999_v33 }
 0x34c   : > { %v2723_v21 = vpop.eup %2722  ;;  %2726 = vrcp.f32 %v929_v22 }
 0x34d   : > { %v953_v28 = vmul.f32 %v2723_v21, %v3003_v37 }
 0x34f   : > { %v938_v25 = vpop.xlane.xlu0 %937  ;;  %2584 = vmatprep.mubr.msk.f32.mxu0 %vm506_vm1, %v953_v28  ;;  %v1472_v39 = vpop.permute.xlu1 %1471 }
 0x350   : > { %2585 = vmatmul.mubr.msk.f32.vlgmr.msra.gmra.mxu0 %vm506_vm1, %v954_v26  ;;  %2728 = vrcp.f32 %v938_v25 }
 0x351   : > { %2595 = vmatpush3.msra.mxu0 %v3044_v63 }
 0x352   : > { %2596 = vmatprep.subr.mxu0 %v3094_v27  ;;  %v2725_v30 = vpop.eup %2724 }
 0x353   : > { %v935_v29 = vpop.xlane.xlu0 %934  ;;  %2597 = vmatpush3.msra.mxu0 %v3094_v27  ;;  %v956_v33 = vmul.f32 %v2725_v30, %v3007_v47 }
 0x354   : > { %2730 = vrcp.f32 %v935_v29  ;;  %2608 = vmatprep.subr.msk.mxu0 %vm506_vm1, %v3047_v0 }
 0x357   : > { %v944_v41 = vpop.xlane.xlu0 %943 }
 0x358   : > { %2732 = vrcp.f32 %v944_v41 }
 0x359   : > { %v2727_v31 = vpop.eup %2726 }
 0x35a   : > { %v955_v32 = vmul.f32 %v2727_v31, %v3011_v50 }
 0x35b   : > { %v1379_v42 = vpop.permute.xlu0 %1378 }
 0x35c   : > { %2591 = vmatprep.mubr.msk.f32.mxu1 %vm506_vm1, %v955_v32 }
 0x35d   : > { %2592 = vmatmul.mubr.msk.f32.vlgmr.msra.gmra.mxu1 %vm506_vm1, %v956_v33  ;;  %v2729_v35 = vpop.eup %2728 }
 0x35e   : > { %2602 = vmatpush3.msra.mxu1 %v3064_v5  ;;  %v958_v37 = vmul.f32 %v2729_v35, %v3015_v54 }
 0x35f   : > { %2603 = vmatprep.subr.mxu1 %v3106_v34  ;;  %v1565_v43 = vpop.permute.xlu0 %1564 }
 0x360   : > { %2604 = vmatpush3.msra.mxu1 %v3106_v34 }
 0x361   : > { %v2731_v23 = vpop.eup %2730  ;;  %2615 = vmatprep.subr.msk.mxu1 %vm506_vm1, %v3054_v3 }
 0x362   : > { %v957_v36 = vmul.f32 %v2731_v23, %v3019_v56 }
 0x363   : > { %v1470_v47 = vpop.permute.xlu0 %1469 }
 0x364   : > { %2598 = vmatprep.mubr.msk.f32.mxu0 %vm506_vm1, %v957_v36 }
 0x365   : > { %2599 = vmatmul.mubr.msk.f32.vlgmr.msra.gmra.mxu0 %vm506_vm1, %v958_v37  ;;  %v2733_v48 = vpop.eup %2732 }
 0x366   : > { %2609 = vmatpush3.xpose.msk.msra.mxu0 %vm506_vm1, %v3047_v0  ;;  %2612 = vmatprep.mubr.msk.f32.mxu0 %vm506_vm1, %v1286_v6  ;;  %v960_v53 = vmul.f32 %v2733_v48, %v3023_v59  ;;  %v491_v0 = vld [vmem:[%s3287_s2 + $0x18] sm:$0xff] }
 0x367   : > { %2610 = vmatprep.subr.msk.mxu0 %vm506_vm1, %v1290_v20  ;;  %v1559_v54 = vpop.permute.xlu0 %1558  ;;  %v1650_v6 = vadd.f32 %v2924_v38, %v491_v0  ;;  %v1652_v26 = vadd.f32 %v2939_v46, %v491_v0  ;;  %v1654_v29 = vadd.f32 %v2959_v58, %v491_v0  ;;  %v1656_v23 = vadd.f32 %v2967_v2, %v491_v0 }
 0x36a   : > { %2611 = vmatpush3.xpose.msk.msra.mxu0 %vm506_vm1, %v1290_v20 }
 0x36b   : > { %2622 = vmatprep.subr.msk.mxu0 %vm506_vm1, %v1474_v13 }
 0x36d   : > { %2613 = vmatmul.mubr.msk.f32.vlgmr.msra.gmra.mxu0 %vm506_vm1, %v1288_v24 }
 0x36e   : > { %2623 = vmatpush3.xpose.msk.msra.mxu0 %vm506_vm1, %v1474_v13 }
 0x36f   : > { %2624 = vmatprep.subr.msk.mxu0 %vm506_vm1, %v1472_v39 }
 0x372   : > { %2625 = vmatpush3.xpose.msk.msra.mxu0 %vm506_vm1, %v1472_v39 }
 0x385   : > { %v941_v44 = vpop.xlane.xlu1 %940 }
 0x386   : > { %2734 = vrcp.f32 %v941_v44 }
 0x389   : > { %v1468_v45 = vpop.permute.xlu1 %1467 }
 0x38a   : > { %2626 = vmatprep.mubr.msk.f32.mxu0 %vm506_vm1, %v1468_v45 }
 0x38b   : > { %2627 = vmatmul.mubr.msk.f32.vlgmr.msra.gmra.mxu0 %vm506_vm1, %v1470_v47 }
 0x38d   : > { %v1563_v55 = vpop.permute.xlu1 %1562 }
 0x391   : > { %v1561_v56 = vpop.permute.xlu1 %1560 }
 0x393   : > { %v2735_v49 = vpop.eup %2734 }
 0x394   : > { %v959_v50 = vmul.f32 %v2735_v49, %v3078_v12 }
 0x396   : > { %2605 = vmatprep.mubr.msk.f32.mxu1 %vm506_vm1, %v959_v50 }
 0x397   : > { %2606 = vmatmul.mubr.msk.f32.vlgmr.msra.gmra.mxu1 %vm506_vm1, %v960_v53 }
 0x398   : > { %2616 = vmatpush3.xpose.msk.msra.mxu1 %vm506_vm1, %v3054_v3  ;;  %2619 = vmatprep.mubr.msk.f32.mxu1 %vm506_vm1, %v3088_v14  ;;  %v490_v3 = vld [vmem:[%s3287_s2 + $0x10] sm:$0xff] }
 0x399   : > { %2617 = vmatprep.subr.msk.mxu1 %vm506_vm1, %v3067_v7  ;;  %v1649_v8 = vadd.f32 %v2932_v40, %v490_v3  ;;  %v1653_v13 = vadd.f32 %v2947_v51, %v490_v3  ;;  %v1651_v21 = vadd.f32 %v2952_v52, %v490_v3  ;;  %v1655_v32 = vadd.f32 %v2990_v10, %v490_v3 }
 0x39c   : > { %2618 = vmatpush3.xpose.msk.msra.mxu1 %vm506_vm1, %v3067_v7 }
 0x39d   : > { %2629 = vmatprep.subr.msk.mxu1 %vm506_vm1, %v1565_v43 }
 0x39f   : > { %2620 = vmatmul.mubr.msk.f32.vlgmr.msra.gmra.mxu1 %vm506_vm1, %v1379_v42 }
 0x3a0   : > { %2630 = vmatpush3.xpose.msk.msra.mxu1 %vm506_vm1, %v1565_v43  ;;  %2633 = vmatprep.mubr.msk.f32.mxu1 %vm506_vm1, %v1559_v54 }
 0x3a1   : > { %2631 = vmatprep.subr.msk.mxu1 %vm506_vm1, %v1563_v55 }
 0x3a4   : > { %2632 = vmatpush3.xpose.msk.msra.mxu1 %vm506_vm1, %v1563_v55 }
 0x3a7   : > { %2634 = vmatmul.mubr.msk.f32.vlgmr.msra.gmra.mxu1 %vm506_vm1, %v1561_v56 }
 0x410   : > { %v3149_v57 = vpop.f32.mrf.mxu0 }
 0x412   : > { %v3151_v59 = vpop.f32.mrf.mxu0 }
 0x41d   : > { %v3169_v18 = vpop.f32.mrf.mxu1 }
 0x41f   : > { %v3171_v40 = vpop.f32.mrf.mxu1 }
 0x425   : > { %v3153_v62 = vpop.f32.mrf.mxu0 }
 0x427   : > { %v3162_v7 = vpop.f32.mrf.mxu0 }
 0x42d   : > { %v2614_v9 = vpop.f32.mrf.mxu0 }
 0x42e   : > { %v1658_v11 = vadd.f32 %v2614_v9, %v1650_v6 }
 0x42f   : > { %v1367_v12 = vpop.f32.mrf.mxu0 }
 0x430   : > { %v1657_v15 = vadd.f32 %v1649_v8, %v1367_v12  ;;  %v1668_v20 = vsel %vm506_vm1, %v1658_v11, -inf }
 0x431   : > { %1669 = vmax.xlane.f32.xlu1 %v1668_v20 }
 0x432   : > { %v1665_v24 = vsel %vm506_vm1, %v1657_v15, -inf }
 0x433   : > { %1666 = vmax.xlane.f32.xlu0 %v1665_v24 }
 0x44b   : > { %v2628_v14 = vpop.f32.mrf.mxu0 }
 0x44c   : > { %v1662_v35 = vadd.f32 %v2628_v14, %v1654_v29 }
 0x44d   : > { %v1549_v16 = vpop.f32.mrf.mxu0 }
 0x44e   : > { %v1661_v17 = vadd.f32 %v1653_v13, %v1549_v16  ;;  %v1680_v39 = vsel %vm506_vm1, %v1662_v35, -inf }
 0x450   : > { %v1677_v38 = vsel %vm506_vm1, %v1661_v17, -inf }
 0x451   : > { %1678 = vmax.xlane.f32.xlu1 %v1677_v38 }
 0x457   : > { %v3173_v19 = vpop.f32.mrf.mxu1 }
 0x459   : > { %v3175_v22 = vpop.f32.mrf.mxu1 }
 0x45f   : > { %v2621_v28 = vpop.f32.mrf.mxu1 }
 0x460   : > { %v1660_v30 = vadd.f32 %v2621_v28, %v1652_v26 }
 0x461   : > { %v1458_v51 = vpop.f32.mrf.mxu1 }
 0x462   : > { %v1659_v25 = vadd.f32 %v1651_v21, %v1458_v51  ;;  %v1674_v36 = vsel %vm506_vm1, %v1660_v30, -inf }
 0x464   : > { %v1671_v31 = vsel %vm506_vm1, %v1659_v25, -inf }
 0x465   : > { %1672 = vmax.xlane.f32.xlu0 %v1671_v31 }
 0x467   : > { %v2635_v33 = vpop.f32.mrf.mxu1 }
 0x468   : > { %v1664_v46 = vadd.f32 %v2635_v33, %v1656_v23 }
 0x469   : > { %1675 = vmax.xlane.f32.xlu0 %v1674_v36  ;;  %v1640_v52 = vpop.f32.mrf.mxu1 }
 0x46a   : > { %v1663_v37 = vadd.f32 %v1655_v32, %v1640_v52  ;;  %v1686_v41 = vsel %vm506_vm1, %v1664_v46, -inf }
 0x46c   : > { %v1683_v58 = vsel %vm506_vm1, %v1663_v37, -inf }
 0x46d   : > { %1681 = vmax.xlane.f32.xlu0 %v1680_v39  ;;  %1684 = vmax.xlane.f32.xlu1 %v1683_v58 }
 0x471   : > { %1687 = vmax.xlane.f32.xlu0 %v1686_v41 }
 0x47e   : > { %1757 = vrot.lane.b32.xlu1 %v3032_v60, %s2778_s22 }
 0x482   : > { %1846 = vrot.lane.b32.xlu1 %v3052_v1, %s2778_s22 }
 0x486   : > { %1844 = vrot.lane.b32.xlu1 %v3058_v4, %s2778_s22 }
 0x487   : > { %1755 = vrot.lane.b32.xlu0 %v3036_v61, %s2778_s22 }
 0x48a   : > { %1933 = vrot.lane.b32.xlu1 %v3094_v27, %s2778_s22 }
 0x48b   : > { %1935 = vrot.lane.b32.xlu0 %v3044_v63, %s2778_s22 }
 0x4ba   : > { %v1670_v2 = vpop.xlane.xlu1 %1669 }
 0x4bb   : > { %v1690_v10 = vsub.f32 %v1658_v11, %v1670_v2 }
 0x4bc   : > { %v1667_v42 = vpop.xlane.xlu0 %1666 }
 0x4bd   : > { %v1699_v43 = vmul.f32 1.442695, %v1690_v10  ;;  %v1689_v60 = vsub.f32 %v1657_v15, %v1667_v42 }
 0x4bf   : > { %2736 = vpow2.f32 %v1699_v43  ;;  %v1697_v44 = vmul.f32 1.442695, %v1689_v60 }
 0x4c1   : > { %2738 = vpow2.f32 %v1697_v44 }
 0x4cc   : > { %v3199_v1 = vpop.eup %2736 }
 0x4cd   : > { %v1716_v4 = vsel %vm506_vm1, %v3199_v1, 0.0 }
 0x4ce   : > { %v3203_v61 = vpop.eup %2738  ;;  %1717 = vadd.xlane.f32.xlu0 %v1716_v4 }
 0x4cf   : > { %v1713_v27 = vsel %vm506_vm1, %v3203_v61, 0.0 }
 0x4d0   : > { %1714 = vadd.xlane.f32.xlu1 %v1713_v27 }
 0x4da   : > { %v1679_v63 = vpop.xlane.xlu1 %1678 }
 0x4db   : > { %v1693_v45 = vsub.f32 %v1661_v17, %v1679_v63 }
 0x4dd   : > { %v1705_v47 = vmul.f32 1.442695, %v1693_v45 }
 0x4df   : > { %2740 = vpow2.f32 %v1705_v47 }
 0x4ec   : > { %v3207_v48 = vpop.eup %2740 }
 0x4ed   : > { %v1725_v49 = vsel %vm506_vm1, %v3207_v48, 0.0 }
 0x4ee   : > { %v1673_v50 = vpop.xlane.xlu0 %1672  ;;  %1726 = vadd.xlane.f32.xlu1 %v1725_v49 }
 0x4ef   : > { %v1691_v53 = vsub.f32 %v1659_v25, %v1673_v50 }
 0x4f1   : > { %v1701_v54 = vmul.f32 1.442695, %v1691_v53  ;;  %v2152_v53 = vld [vmem:[%s3291_s6 + $0x18] sm:$0xff] }
 0x4f2   : > { %v1676_v55 = vpop.xlane.xlu0 %1675 }
 0x4f3   : > { %2742 = vpow2.f32 %v1701_v54  ;;  %v1692_v56 = vsub.f32 %v1660_v30, %v1676_v55  ;;  %v2151_v54 = vld [vmem:[%s3291_s6 + $0x10] sm:$0xff]  ;;  %v2150_v55 = vld [vmem:[%s3291_s6 + $0x8] sm:$0xff] }
 0x4f5   : > { %v1703_v9 = vmul.f32 1.442695, %v1692_v56  ;;  %v2149_v56 = vld [vmem:[%s3291_s6] sm:$0xff] }
 0x4f6   : > { %v1682_v0 = vpop.xlane.xlu0 %1681  ;;  %v1685_v3 = vpop.xlane.xlu1 %1684 }
 0x4f7   : > { %v1694_v6 = vsub.f32 %v1662_v35, %v1682_v0  ;;  %v1695_v8 = vsub.f32 %v1663_v37, %v1685_v3 }
 0x4f9   : > { %v1707_v11 = vmul.f32 1.442695, %v1694_v6  ;;  %v1709_v12 = vmul.f32 1.442695, %v1695_v8 }
 0x4fa   : > { %v1688_v15 = vpop.xlane.xlu0 %1687  ;;  %v1758_v20 = vpop.permute.xlu1 %1757 }
 0x4fb   : > { %2744 = vpow2.f32 %v1707_v11  ;;  %v1696_v24 = vsub.f32 %v1664_v46, %v1688_v15  ;;  %2636 = vmatprep.subr.mxu0 %v1758_v20 }
 0x4fc   : > { %2746 = vpow2.f32 %v1709_v12  ;;  %2637 = vmatpush3.msra.mxu0 %v1758_v20 }
 0x4fd   : > { %2748 = vpow2.f32 %v1703_v9  ;;  %v1711_v13 = vmul.f32 1.442695, %v1696_v24 }
 0x4fe   : > { %v1847_v14 = vpop.permute.xlu1 %1846  ;;  %v1756_v16 = vpop.permute.xlu0 %1755 }
 0x4ff   : > { %2643 = vmatprep.subr.mxu1 %v1847_v14  ;;  %2638 = vmatprep.subr.mxu0 %v1756_v16  ;;  %2750 = vpow2.f32 %v1711_v13 }
 0x500   : > { %v2743_v17 = vpop.eup %2742  ;;  %2644 = vmatpush3.msra.mxu1 %v1847_v14  ;;  %2639 = vmatpush3.msra.mxu0 %v1756_v16 }
 0x501   : > { %v1719_v38 = vsel %vm506_vm1, %v2743_v17, 0.0 }
 0x502   : > { %1720 = vadd.xlane.f32.xlu1 %v1719_v38  ;;  %v1845_v21 = vpop.permute.xlu1 %1844  ;;  %v1936_v28 = vpop.permute.xlu0 %1935 }
 0x503   : > { %2645 = vmatprep.subr.mxu1 %v1845_v21  ;;  %2650 = vmatprep.subr.mxu0 %v1936_v28 }
 0x504   : > { %2646 = vmatpush3.msra.mxu1 %v1845_v21 }
 0x506   : > { %v1934_v35 = vpop.permute.xlu1 %1933 }
 0x508   : > { %v2745_v26 = vpop.eup %2744 }
 0x509   : > { %v2747_v51 = vpop.eup %2746  ;;  %v1728_v25 = vsel %vm506_vm1, %v2745_v26, 0.0 }
 0x50a   : > { %v2749_v29 = vpop.eup %2748  ;;  %1729 = vadd.xlane.f32.xlu0 %v1728_v25  ;;  %v1731_v30 = vsel %vm506_vm1, %v2747_v51, 0.0 }
 0x50b   : > { %1732 = vadd.xlane.f32.xlu1 %v1731_v30  ;;  %v1722_v31 = vsel %vm506_vm1, %v2749_v29, 0.0 }
 0x50c   : > { %v2751_v32 = vpop.eup %2750 }
 0x50d   : > { %v1734_v33 = vsel %vm506_vm1, %v2751_v32, 0.0 }
 0x50e   : > { %1723 = vadd.xlane.f32.xlu0 %v1722_v31 }
 0x512   : > { %1735 = vadd.xlane.f32.xlu0 %v1734_v33 }
 0x51c   : > { %2022 = vrot.lane.b32.xlu1 %v3106_v34, %s2778_s22 }
 0x528   : > { %2024 = vrot.lane.b32.xlu0 %v3064_v5, %s2778_s22 }
 0x557   : > { %v1718_v23 = vpop.xlane.xlu0 %1717 }
 0x558   : > { %2752 = vrcp.f32 %v1718_v23 }
 0x559   : > { %v1715_v36 = vpop.xlane.xlu1 %1714 }
 0x55a   : > { %2754 = vrcp.f32 %v1715_v36 }
 0x565   : > { %v2753_v52 = vpop.eup %2752 }
 0x566   : > { %v1746_v39 = vmul.f32 %v2753_v52, %v3199_v1 }
 0x567   : > { %v2755_v37 = vpop.eup %2754 }
 0x568   : > { %v1745_v46 = vmul.f32 %v2755_v37, %v3203_v61 }
 0x56a   : > { %2640 = vmatprep.mubr.msk.f32.mxu0 %vm506_vm1, %v1745_v46 }
 0x56b   : > { %2641 = vmatmul.mubr.msk.f32.vlgmr.msra.gmra.mxu0 %vm506_vm1, %v1746_v39 }
 0x56c   : > { %2651 = vmatpush3.msra.mxu0 %v1936_v28 }
 0x56d   : > { %2652 = vmatprep.subr.mxu0 %v1934_v35 }
 0x56e   : > { %2653 = vmatpush3.msra.mxu0 %v1934_v35 }
 0x56f   : > { %2664 = vmatprep.subr.mxu0 %v2152_v53 }
 0x577   : > { %v1727_v34 = vpop.xlane.xlu1 %1726 }
 0x578   : > { %2756 = vrcp.f32 %v1727_v34 }
 0x585   : > { %v2757_v5 = vpop.eup %2756 }
 0x586   : > { %v1749_v58 = vmul.f32 %v2757_v5, %v3207_v48 }
 0x588   : > { %2654 = vmatprep.mubr.msk.f32.mxu0 %vm506_vm1, %v1749_v58 }
 0x58b   : > { %v1721_v41 = vpop.xlane.xlu1 %1720 }
 0x58c   : > { %2758 = vrcp.f32 %v1721_v41 }
 0x593   : > { %v1730_v2 = vpop.xlane.xlu0 %1729 }
 0x594   : > { %2760 = vrcp.f32 %v1730_v2  ;;  %v1733_v10 = vpop.xlane.xlu1 %1732 }
 0x595   : > { %2762 = vrcp.f32 %v1733_v10 }
 0x597   : > { %v1724_v42 = vpop.xlane.xlu0 %1723 }
 0x598   : > { %2764 = vrcp.f32 %v1724_v42  ;;  %v2023_v48 = vpop.permute.xlu1 %2022 }
 0x599   : > { %v2759_v43 = vpop.eup %2758 }
 0x59a   : > { %v1747_v60 = vmul.f32 %v2759_v43, %v2743_v17 }
 0x59b   : > { %v1736_v44 = vpop.xlane.xlu0 %1735 }
 0x59c   : > { %2766 = vrcp.f32 %v1736_v44  ;;  %2647 = vmatprep.mubr.msk.f32.mxu1 %vm506_vm1, %v1747_v60 }
 0x59f   : > { %v2025_v1 = vpop.permute.xlu0 %2024 }
 0x5a0   : > { %2657 = vmatprep.subr.mxu1 %v2025_v1 }
 0x5a1   : > { %v2761_v4 = vpop.eup %2760 }
 0x5a2   : > { %v1750_v61 = vmul.f32 %v2761_v4, %v2745_v26  ;;  %v2763_v27 = vpop.eup %2762 }
 0x5a3   : > { %v1751_v47 = vmul.f32 %v2763_v27, %v2747_v51 }
 0x5a4   : > { %2655 = vmatmul.mubr.msk.f32.vlgmr.msra.gmra.mxu0 %vm506_vm1, %v1750_v61 }
 0x5a5   : > { %v2765_v63 = vpop.eup %2764  ;;  %2665 = vmatpush3.msra.mxu0 %v2152_v53 }
 0x5a6   : > { %v1748_v45 = vmul.f32 %v2765_v63, %v2749_v29  ;;  %2666 = vmatprep.subr.mxu0 %v2151_v54 }
 0x5a7   : > { %2667 = vmatpush3.msra.mxu0 %v2151_v54 }
 0x5a8   : > { %2648 = vmatmul.mubr.msk.f32.vlgmr.msra.gmra.mxu1 %vm506_vm1, %v1748_v45  ;;  %2668 = vmatprep.subr.mxu0 %v2150_v55 }
 0x5a9   : > { %v2767_v49 = vpop.eup %2766  ;;  %2658 = vmatpush3.msra.mxu1 %v2025_v1  ;;  %2661 = vmatprep.mubr.msk.f32.mxu1 %vm506_vm1, %v1751_v47 }
 0x5aa   : > { %2659 = vmatprep.subr.mxu1 %v2023_v48  ;;  %v1752_v50 = vmul.f32 %v2767_v49, %v2751_v32  ;;  %2669 = vmatpush3.msra.mxu0 %v2150_v55 }
 0x5ab   : > { %2660 = vmatpush3.msra.mxu1 %v2023_v48  ;;  %2670 = vmatprep.subr.mxu0 %v2149_v56 }
 0x5ac   : > { %2662 = vmatmul.mubr.msk.f32.vlgmr.msra.gmra.mxu1 %vm506_vm1, %v1752_v50  ;;  %2671 = vmatpush3.msra.mxu0 %v2149_v56 }
 0x62b   : > { %v2642_v0 = vpop.f32.mrf.mxu0 }
 0x62c   : > { %2119 = vrot.lane.b32.xlu1 %v2642_v0, %s2779_s20 }
 0x62d   : > { %v1833_v3 = vpop.f32.mrf.mxu0 }
 0x62e   : > { %2117 = vrot.lane.b32.xlu0 %v1833_v3, %s2779_s20 }
 0x664   : > { %v2656_v8 = vpop.f32.mrf.mxu0 }
 0x666   : > { %v2011_v11 = vpop.f32.mrf.mxu0 }
 0x668   : > { %v2649_v6 = vpop.f32.mrf.mxu1 }
 0x669   : > { %2123 = vrot.lane.b32.xlu1 %v2649_v6, %s2779_s20 }
 0x66a   : > { %v1922_v9 = vpop.f32.mrf.mxu1 }
 0x66b   : > { %2121 = vrot.lane.b32.xlu0 %v1922_v9, %s2779_s20 }
 0x66c   : > { %v2663_v12 = vpop.f32.mrf.mxu1 }
 0x66d   : > { %2127 = vrot.lane.b32.xlu1 %v2656_v8, %s2779_s20 }
 0x66e   : > { %v2100_v15 = vpop.f32.mrf.mxu1 }
 0x66f   : > { %2125 = vrot.lane.b32.xlu0 %v2011_v11, %s2779_s20 }
 0x671   : > { %2131 = vrot.lane.b32.xlu1 %v2663_v12, %s2779_s20 }
 0x673   : > { %2129 = vrot.lane.b32.xlu0 %v2100_v15, %s2779_s20 }
 0x69e   : > { %v2120_v20 = vpop.permute.xlu1 %2119 }
 0x69f   : > { %v2142_v14 = vsel %vm506_vm1, %v3149_v57, %v2120_v20 }
 0x6a0   : > { %v2118_v24 = vpop.permute.xlu0 %2117 }
 0x6a1   : > { %v2141_v13 = vsel %vm506_vm1, %v3151_v59, %v2118_v24 }
 0x6a2   : > { %2672 = vmatprep.mubr.msk.f32.mxu0 %vm350_vm0, %v2141_v13 }
 0x6a3   : > { %2673 = vmatmul.mubr.msk.f32.vlgmr.msra.gmra.mxu0 %vm350_vm0, %v2142_v14 }
 0x6db   : > { %v2124_v16 = vpop.permute.xlu1 %2123 }
 0x6dc   : > { %v2144_v21 = vsel %vm506_vm1, %v3169_v18, %v2124_v16 }
 0x6dd   : > { %v2122_v17 = vpop.permute.xlu0 %2121 }
 0x6de   : > { %v2143_v38 = vsel %vm506_vm1, %v3171_v40, %v2122_v17 }
 0x6df   : > { %2675 = vmatprep.mubr.msk.f32.mxu0 %vm350_vm0, %v2143_v38  ;;  %v2128_v28 = vpop.permute.xlu1 %2127 }
 0x6e0   : > { %2676 = vmatmul.mubr.msk.f32.gmra.mxu0 %vm350_vm0, %v2144_v21  ;;  %v2146_v26 = vsel %vm506_vm1, %v3153_v62, %v2128_v28  ;;  %v2433_v62 = vld [vmem:[%s3292_s7] ss:$0 sm:$0xff] }
 0x6e1   : > { %v2126_v59 = vpop.permute.xlu0 %2125 }
 0x6e2   : > { %v2145_v57 = vsel %vm506_vm1, %v3162_v7, %v2126_v59 }
 0x6e3   : > { %2678 = vmatprep.mubr.msk.f32.mxu0 %vm350_vm0, %v2145_v57  ;;  %v2132_v51 = vpop.permute.xlu1 %2131 }
 0x6e4   : > { %2679 = vmatmul.mubr.msk.f32.gmra.mxu0 %vm350_vm0, %v2146_v26  ;;  %v2148_v25 = vsel %vm506_vm1, %v3173_v19, %v2132_v51 }
 0x6e5   : > { %v2130_v40 = vpop.permute.xlu0 %2129 }
 0x6e6   : > { %v2147_v18 = vsel %vm506_vm1, %v3175_v22, %v2130_v40 }
 0x6e7   : > { %2681 = vmatprep.mubr.msk.f32.mxu0 %vm350_vm0, %v2147_v18 }
 0x6e8   : > { %2682 = vmatmul.mubr.msk.f32.gmra.mxu0 %vm350_vm0, %v2148_v25 }
 0x763   : > { %v2674_v7 = vpop.f32.mrf.mxu0 }
 0x764   : > { %v2256_v29 = vadd.f32 %v2674_v7, %v2433_v62 }
 0x765   : > { %v2250_v30 = vpop.f32.mrf.mxu0 }
 0x766   : > { %2290 = vst.msk [vmem:[%s329_s25 + $0x8] sm:$0xff] %vm350_vm0, %v2256_v29  ;;  %v2251_v22 = vadd.f32 %v2433_v62, %v2250_v30 }
 0x768   : > { %2289 = vst.msk [vmem:[%s329_s25] sm:$0xff] %vm350_vm0, %v2251_v22 }
 0x7a0   : > { %v2677_v19 = vpop.f32.mrf.mxu0 }
 0x7a1   : > { %v2266_v31 = vadd.f32 %v2677_v19, %v2433_v62 }
 0x7a2   : > { %v2260_v32 = vpop.f32.mrf.mxu0 }
 0x7a3   : > { %2292 = vst.msk [vmem:[%s329_s25 + $0x18] sm:$0xff] %vm350_vm0, %v2266_v31  ;;  %v2261_v33 = vadd.f32 %v2433_v62, %v2260_v32 }
 0x7a4   : > { %v2680_v35 = vpop.f32.mrf.mxu0 }
 0x7a5   : > { %2291 = vst.msk [vmem:[%s329_s25 + $0x10] sm:$0xff] %vm350_vm0, %v2261_v33  ;;  %v2276_v23 = vadd.f32 %v2680_v35, %v2433_v62 }
 0x7a6   : > { %v2270_v36 = vpop.f32.mrf.mxu0 }
 0x7a7   : > { %2294 = vst.msk [vmem:[%s329_s25 + $0x28] sm:$0xff] %vm350_vm0, %v2276_v23  ;;  %v2271_v52 = vadd.f32 %v2433_v62, %v2270_v36 }
 0x7a8   : > { %v2683_v37 = vpop.f32.mrf.mxu0 }
 0x7a9   : > { %2293 = vst.msk [vmem:[%s329_s25 + $0x20] sm:$0xff] %vm350_vm0, %v2271_v52  ;;  %v2286_v46 = vadd.f32 %v2683_v37, %v2433_v62 }
 0x7aa   : > { %v2280_v39 = vpop.f32.mrf.mxu0 }
 0x7ab   : > { %2296 = vst.msk [vmem:[%s329_s25 + $0x38] sm:$0xff] %vm350_vm0, %v2286_v46  ;;  %v2281_v34 = vadd.f32 %v2433_v62, %v2280_v39 }
 0x7ad   : > { %2295 = vst.msk [vmem:[%s329_s25 + $0x30] sm:$0xff] %vm350_vm0, %v2281_v34 }
 0x7ae PF: > { %s18_s27 = sadd.s32 1, %s2774_s27  }
 0x7af   : > { %p15_p4 = scmp.ge.s32.totalorder %s18_s27, 4  }
 0x7b1   :  { %17 = sbr.rel (!%p15_p4) target bundleno = 1 (0x1), region = 85 }

// kernel: tpu_custom_call.1
= control target key start
LH: loop header
LB: loop body
LE: loop exit
PB: predicated region body
PF: predicated region fallthrough
CT: control target
= control target key end

     0   :  { %s2825_s27 = smov 0   ;;  %s3285_s0 = inlined_call_operand.vmem [shape: f32[128,32], index: 0, kind: input, shape index: {}]   ;;  %s3286_s1 = inlined_call_operand.vmem [shape: f32[128,32], index: 1, kind: input, shape index: {}]   ;;  %s3287_s2 = inlined_call_operand.vmem [shape: f32[2,16,16], index: 2, kind: input, shape index: {}]   ;;  %s3288_s3 = inlined_call_operand.vmem [shape: f32[4,16,16], index: 3, kind: input, shape index: {}]   ;;  %s3289_s4 = inlined_call_operand.vmem [shape: f32[32,64], index: 4, kind: input, shape index: {}]   ;;  %s3290_s5 = inlined_call_operand.vmem [shape: f32[1,64], index: 5, kind: input, shape index: {}]   ;;  %s3291_s6 = inlined_call_operand.vmem [shape: f32[32,32], index: 6, kind: input, shape index: {}]   ;;  %s3292_s7 = inlined_call_operand.vmem [shape: f32[1,32], index: 7, kind: input, shape index: {}]   ;;  %s3293_s8 = inlined_call_operand.vmem [shape: f32[128,32], index: 8, kind: output, shape index: {}]  }
   0x1 LB: > { %s2365_s28 = sadd.s32 4294967295, %s2774_s27   ;;  %p2369_p0 = scmp.ge.s32.totalorder %s2774_s27, 1  ;;  %s2774_s27 = sphi %s2825_s27, %s18_s27  }
   0x2   : > { %p274_p1 = scmp.lt.s32.totalorder %s2774_s27, 3 }
   0x4   : > { %p275_p2 = pnand %p2369_p0, %p274_p1 }
   0x5   : > { %s2370_s11 = sshll.u32 (!%p275_p2), %s2365_s28, 3  ;;  %s2776_s22 = smov (!%p275_p2), 96  }
   0x6   : > { %278 = sbr.rel (%p275_p2) target bundleno = 1966 (0x7ae), region = 52  ;;  %p314_p3 = scmp.lt.s32.totalorder (!%p275_p2), %s2370_s11, 15 }
   0x7   : > { %s2777_s21 = smov (!%p275_p2), 80   ;;  %s2779_s20 = smov (!%p275_p2), 16  }
   0xb   : > { %v342_v0 = vld [vmem:[%s3289_s4 + $0x18] sm:$0xff]  ;;  %v341_v1 = vld [vmem:[%s3289_s4 + $0x10] sm:$0xff]  ;;  %v340_v2 = vld [vmem:[%s3289_s4 + $0x8] sm:$0xff]  ;;  %s3295_s11 = smov (!%p314_p3, %s2370_s11), 15  ;;  %vm350_vm0 = vcmask 261120   ;;  %vm506_vm1 = vcmask 130048  }
   0xc   : > { %2532 = vmatprep.subr.mxu0 %v342_v0  ;;  %2684 = vmatprep.subr.mxu1 %v342_v0  ;;  %v339_v3 = vld [vmem:[%s3289_s4] sm:$0xff]  ;;  %s2845_s16 = sshll.u32 %s3295_s11, 3  ;;  %v489_v37 = vld [vmem:[%s3287_s2 + $0x8] sm:$0xff]  ;;  %v2939_v46 = vld [vmem:[%s3288_s3 + $0x18] sm:$0xff] }
   0xd   : > { %2533 = vmatpush3.msra.mxu0 %v342_v0  ;;  %2688 = vmatpush3.msra.mxu1 %v342_v0  ;;  %s317_s19 = scalar_lea.vmem %s3285_s0, %s2845_s16  ;;  %v2376_v12 = vld [vmem:[%s3290_s5] ss:$0 sm:$0xff]  ;;  %v2924_v38 = vld [vmem:[%s3288_s3 + $0x8] sm:$0xff]  ;;  %v860_v50 = vadd.f32 %v2939_v46, %v489_v37  ;;  %v2952_v52 = vld [vmem:[%s3288_s3 + $0x10] sm:$0xff]  ;;  %s3029_s28 = scalar_lea.vmem %s3286_s1, %s2845_s16 }
   0xe   : > { %2534 = vmatprep.subr.mxu0 %v341_v1  ;;  %2685 = vmatprep.subr.mxu1 %v341_v1  ;;  %v331_v4 = vld [vmem:[%s317_s19] sm:$0xff]  ;;  %v332_v5 = vld [vmem:[%s317_s19 + $0x8] sm:$0xff]  ;;  %v333_v6 = vld [vmem:[%s317_s19 + $0x10] sm:$0xff]  ;;  %v858_v41 = vadd.f32 %v2924_v38, %v489_v37  ;;  %s329_s25 = scalar_lea.vmem %s3293_s8, %s2845_s16 }
   0xf   : > { %2535 = vmatpush3.msra.mxu0 %v341_v1  ;;  %2689 = vmatpush3.msra.mxu1 %v341_v1  ;;  %v335_v7 = vld [vmem:[%s317_s19 + $0x20] sm:$0xff]  ;;  %v336_v8 = vld [vmem:[%s317_s19 + $0x28] sm:$0xff]  ;;  %v337_v9 = vld [vmem:[%s317_s19 + $0x30] sm:$0xff] }
  0x10   : > { %2536 = vmatprep.subr.mxu0 %v340_v2  ;;  %2686 = vmatprep.subr.mxu1 %v340_v2  ;;  %v334_v10 = vld [vmem:[%s317_s19 + $0x18] sm:$0xff]  ;;  %v488_v39 = vld [vmem:[%s3287_s2] sm:$0xff]  ;;  %v2959_v58 = vld [vmem:[%s3288_s3 + $0x28] sm:$0xff] }
  0x11   : > { %2537 = vmatpush3.msra.mxu0 %v340_v2  ;;  %2690 = vmatpush3.msra.mxu1 %v340_v2  ;;  %v338_v11 = vld [vmem:[%s317_s19 + $0x38] sm:$0xff]  ;;  %v2932_v40 = vld [vmem:[%s3288_s3] sm:$0xff]  ;;  %v859_v57 = vadd.f32 %v2952_v52, %v488_v39  ;;  %v862_v63 = vadd.f32 %v2959_v58, %v489_v37 }
  0x12   : > { %2538 = vmatprep.subr.mxu0 %v339_v3  ;;  %2687 = vmatprep.subr.mxu1 %v339_v3  ;;  %v857_v42 = vadd.f32 %v2932_v40, %v488_v39  ;;  %v2947_v51 = vld [vmem:[%s3288_s3 + $0x20] sm:$0xff]  ;;  %v2967_v2 = vld [vmem:[%s3288_s3 + $0x38] sm:$0xff] }
  0x13   : > { %2539 = vmatpush3.msra.mxu0 %v339_v3  ;;  %2540 = vmatprep.mubr.msk.f32.mxu0 %vm350_vm0, %v331_v4  ;;  %v861_v54 = vadd.f32 %v2947_v51, %v488_v39  ;;  %v864_v4 = vadd.f32 %v2967_v2, %v489_v37 }
  0x14   : > { %2541 = vmatmul.mubr.msk.f32.vlgmr.msra.gmra.mxu0 %vm350_vm0, %v332_v5  ;;  %2691 = vmatpush3.msra.mxu1 %v339_v3 }
  0x15   : > { %2543 = vmatprep.mubr.msk.f32.mxu0 %vm350_vm0, %v333_v6  ;;  %2546 = vmatprep.mubr.msk.f32.mxu1 %vm350_vm0, %v335_v7 }
  0x16   : > { %2547 = vmatmul.mubr.msk.f32.vlgmr.msra.gmra.mxu1 %vm350_vm0, %v336_v8 }
  0x17   : > { %2549 = vmatprep.mubr.msk.f32.mxu1 %vm350_vm0, %v337_v9 }
  0x18   : > { %2544 = vmatmul.mubr.msk.f32.gmra.mxu0 %vm350_vm0, %v334_v10  ;;  %v2990_v10 = vld [vmem:[%s3288_s3 + $0x30] sm:$0xff] }
  0x1a   : > { %2550 = vmatmul.mubr.msk.f32.gmra.mxu1 %vm350_vm0, %v338_v11  ;;  %v863_v11 = vadd.f32 %v2990_v10, %v488_v39 }
  0xd4   : > { %v2542_v13 = vpop.f32.mrf.mxu0 }
  0xd5   : > { %v2862_v14 = vadd.f32 %v2542_v13, %v2376_v12 }
  0xd6   : > { %v441_v15 = vpop.f32.mrf.mxu0  ;;  %v2548_v16 = vpop.f32.mrf.mxu1 }
  0xd7   : > { %v2864_v17 = vadd.f32 %v2376_v12, %v441_v15  ;;  %504 = vrot.lane.b32.xlu0 %v2862_v14, %s2776_s22  ;;  %v2877_v24 = vadd.f32 %v2548_v16, %v2376_v12 }
  0xd8   : > { %v2545_v18 = vpop.f32.mrf.mxu0  ;;  %v461_v19 = vpop.f32.mrf.mxu1 }
  0xd9   : > { %v2867_v20 = vadd.f32 %v2545_v18, %v2376_v12  ;;  %2556 = vmatprep.mubr.msk.f32.mxu1 %vm506_vm1, %v2864_v17  ;;  %v2871_v22 = vadd.f32 %v2376_v12, %v461_v19 }
  0xda   : > { %v451_v21 = vpop.f32.mrf.mxu0  ;;  %v2551_v25 = vpop.f32.mrf.mxu1 }
  0xdb   : > { %594 = vrot.lane.b32.xlu1 %v2867_v20, %s2776_s22  ;;  %502 = vrot.lane.b32.xlu0 %v2864_v17, %s2776_s22  ;;  %v2875_v23 = vadd.f32 %v2376_v12, %v451_v21  ;;  %v2883_v26 = vadd.f32 %v2551_v25, %v2376_v12 }
  0xdc   : > { %2570 = vmatprep.mubr.msk.f32.mxu0 %vm506_vm1, %v2871_v22  ;;  %v471_v27 = vpop.f32.mrf.mxu1 }
  0xdd   : > { %v2887_v28 = vadd.f32 %v2376_v12, %v471_v27 }
  0xdf   : > { %592 = vrot.lane.b32.xlu1 %v2875_v23, %s2776_s22  ;;  %683 = vrot.lane.b32.xlu0 %v2877_v24, %s2776_s22 }
  0xe3   : > { %681 = vrot.lane.b32.xlu1 %v2871_v22, %s2776_s22  ;;  %772 = vrot.lane.b32.xlu0 %v2883_v26, %s2776_s22 }
  0xe7   : > { %770 = vrot.lane.b32.xlu1 %v2887_v28, %s2776_s22  ;;  %s2778_s22 = smov 112  }
 0x149   : > { %v505_v29 = vpop.permute.xlu0 %504 }
 0x14a   : > { %2552 = vmatprep.subr.msk.mxu1 %vm506_vm1, %v505_v29 }
 0x14b   : > { %2553 = vmatpush3.xpose.msk.msra.mxu1 %vm506_vm1, %v505_v29 }
 0x14d   : > { %v595_v30 = vpop.permute.xlu1 %594  ;;  %v503_v31 = vpop.permute.xlu0 %502 }
 0x14e   : > { %2554 = vmatprep.subr.msk.mxu1 %vm506_vm1, %v503_v31 }
 0x14f   : > { %2555 = vmatpush3.xpose.msk.msra.mxu1 %vm506_vm1, %v503_v31 }
 0x150   : > { %2559 = vmatprep.subr.msk.mxu1 %vm506_vm1, %v595_v30 }
 0x151   : > { %v593_v32 = vpop.permute.xlu1 %592  ;;  %v684_v33 = vpop.permute.xlu0 %683 }
 0x152   : > { %2557 = vmatmul.mubr.msk.f32.vlgmr.msra.gmra.mxu1 %vm506_vm1, %v2862_v14  ;;  %2566 = vmatprep.subr.msk.mxu0 %vm506_vm1, %v684_v33 }
 0x153   : > { %2560 = vmatpush3.xpose.msk.msra.mxu1 %vm506_vm1, %v595_v30  ;;  %2563 = vmatprep.mubr.msk.f32.mxu1 %vm506_vm1, %v2875_v23 }
 0x154   : > { %2567 = vmatpush3.xpose.msk.msra.mxu0 %vm506_vm1, %v684_v33  ;;  %2561 = vmatprep.subr.msk.mxu1 %vm506_vm1, %v593_v32 }
 0x155   : > { %v682_v34 = vpop.permute.xlu1 %681  ;;  %v773_v35 = vpop.permute.xlu0 %772 }
 0x156   : > { %2568 = vmatprep.subr.msk.mxu0 %vm506_vm1, %v682_v34 }
 0x157   : > { %2562 = vmatpush3.xpose.msk.msra.mxu1 %vm506_vm1, %v593_v32 }
 0x158   : > { %2569 = vmatpush3.xpose.msk.msra.mxu0 %vm506_vm1, %v682_v34  ;;  %2573 = vmatprep.subr.msk.mxu1 %vm506_vm1, %v773_v35 }
 0x159   : > { %v771_v36 = vpop.permute.xlu1 %770 }
 0x15a   : > { %2564 = vmatmul.mubr.msk.f32.vlgmr.msra.gmra.mxu1 %vm506_vm1, %v2867_v20 }
 0x15b   : > { %2571 = vmatmul.mubr.msk.f32.vlgmr.msra.gmra.mxu0 %vm506_vm1, %v2877_v24  ;;  %2574 = vmatpush3.xpose.msk.msra.mxu1 %vm506_vm1, %v773_v35 }
 0x15c   : > { %2577 = vmatprep.mubr.msk.f32.mxu1 %vm506_vm1, %v2887_v28  ;;  %2575 = vmatprep.subr.msk.mxu1 %vm506_vm1, %v771_v36 }
 0x15f   : > { %2576 = vmatpush3.xpose.msk.msra.mxu1 %vm506_vm1, %v771_v36 }
 0x162   : > { %2578 = vmatmul.mubr.msk.f32.vlgmr.msra.gmra.mxu1 %vm506_vm1, %v2883_v26 }
 0x212   : > { %v2558_v43 = vpop.f32.mrf.mxu1 }
 0x213   : > { %v866_v44 = vadd.f32 %v2558_v43, %v858_v41 }
 0x214   : > { %v581_v45 = vpop.f32.mrf.mxu1 }
 0x215   : > { %v865_v47 = vadd.f32 %v857_v42, %v581_v45  ;;  %v876_v48 = vsel %vm506_vm1, %v866_v44, -inf }
 0x216   : > { %877 = vmax.xlane.f32.xlu1 %v876_v48 }
 0x217   : > { %v873_v49 = vsel %vm506_vm1, %v865_v47, -inf }
 0x218   : > { %874 = vmax.xlane.f32.xlu0 %v873_v49 }
 0x21a   : > { %v2565_v53 = vpop.f32.mrf.mxu1 }
 0x21b   : > { %v868_v55 = vadd.f32 %v2565_v53, %v860_v50  ;;  %v2572_v56 = vpop.f32.mrf.mxu0 }
 0x21c   : > { %v670_v59 = vpop.f32.mrf.mxu1  ;;  %v870_v3 = vadd.f32 %v2572_v56, %v862_v63  ;;  %v3044_v63 = vld [vmem:[%s3029_s28 + $0x28] sm:$0xff] }
 0x21d   : > { %v759_v60 = vpop.f32.mrf.mxu0  ;;  %v882_v61 = vsel %vm506_vm1, %v868_v55, -inf  ;;  %v867_v0 = vadd.f32 %v859_v57, %v670_v59 }
 0x21e   : > { %v869_v62 = vadd.f32 %v861_v54, %v759_v60  ;;  %883 = vmax.xlane.f32.xlu1 %v882_v61  ;;  %v888_v8 = vsel %vm506_vm1, %v870_v3, -inf  ;;  %v3032_v60 = vld [vmem:[%s3029_s28 + $0x8] sm:$0xff]  ;;  %v3036_v61 = vld [vmem:[%s3029_s28] sm:$0xff] }
 0x21f   : > { %v879_v5 = vsel %vm506_vm1, %v867_v0, -inf  ;;  %2580 = vmatprep.subr.mxu0 %v3032_v60 }
 0x220   : > { %v885_v1 = vsel %vm506_vm1, %v869_v62, -inf  ;;  %2581 = vmatpush3.msra.mxu0 %v3032_v60 }
 0x221   : > { %886 = vmax.xlane.f32.xlu0 %v885_v1  ;;  %2582 = vmatprep.subr.mxu0 %v3036_v61  ;;  %v3052_v1 = vld [vmem:[%s3029_s28 + $0x18] sm:$0xff] }
 0x222   : > { %v2579_v6 = vpop.f32.mrf.mxu1  ;;  %2583 = vmatpush3.msra.mxu0 %v3036_v61  ;;  %2587 = vmatprep.subr.mxu1 %v3052_v1 }
 0x223   : > { %v872_v7 = vadd.f32 %v2579_v6, %v864_v4  ;;  %2594 = vmatprep.subr.mxu0 %v3044_v63  ;;  %v3058_v4 = vld [vmem:[%s3029_s28 + $0x10] sm:$0xff]  ;;  %2588 = vmatpush3.msra.mxu1 %v3052_v1 }
 0x224   : > { %v848_v12 = vpop.f32.mrf.mxu1  ;;  %2589 = vmatprep.subr.mxu1 %v3058_v4 }
 0x225   : > { %880 = vmax.xlane.f32.xlu0 %v879_v5  ;;  %v894_v9 = vsel %vm506_vm1, %v872_v7, -inf  ;;  %v2993_v13 = vadd.f32 %v863_v11, %v848_v12  ;;  %2590 = vmatpush3.msra.mxu1 %v3058_v4  ;;  %v3064_v5 = vld [vmem:[%s3029_s28 + $0x38] sm:$0xff] }
 0x226   : > { %2601 = vmatprep.subr.mxu1 %v3064_v5 }
 0x227   : > { %v891_v15 = vsel %vm506_vm1, %v2993_v13, -inf }
 0x229   : > { %889 = vmax.xlane.f32.xlu0 %v888_v8 }
 0x22d   : > { %895 = vmax.xlane.f32.xlu0 %v894_v9 }
 0x22f   : > { %1291 = vrot.lane.b32.xlu1 %v2862_v14, %s2777_s21 }
 0x233   : > { %1382 = vrot.lane.b32.xlu1 %v2867_v20, %s2777_s21 }
 0x237   : > { %1285 = vrot.lane.b32.xlu1 %v2864_v17, %s2778_s22 }
 0x23b   : > { %1380 = vrot.lane.b32.xlu1 %v2875_v23, %s2777_s21 }
 0x243   : > { %1289 = vrot.lane.b32.xlu0 %v2864_v17, %s2777_s21 }
 0x247   : > { %1287 = vrot.lane.b32.xlu0 %v2862_v14, %s2778_s22 }
 0x24b   : > { %1473 = vrot.lane.b32.xlu0 %v2877_v24, %s2777_s21 }
 0x25f   : > { %892 = vmax.xlane.f32.xlu1 %v891_v15 }
 0x270   : > { %1376 = vrot.lane.b32.xlu1 %v2875_v23, %s2778_s22 }
 0x29f   : > { %v878_v14 = vpop.xlane.xlu1 %877 }
 0x2a0   : > { %v898_v16 = vsub.f32 %v866_v44, %v878_v14 }
 0x2a1   : > { %v875_v17 = vpop.xlane.xlu0 %874 }
 0x2a2   : > { %v907_v18 = vmul.f32 1.442695, %v898_v16  ;;  %v897_v19 = vsub.f32 %v865_v47, %v875_v17 }
 0x2a4   : > { %2704 = vpow2.f32 %v907_v18  ;;  %v905_v21 = vmul.f32 1.442695, %v897_v19 }
 0x2a6   : > { %2706 = vpow2.f32 %v905_v21 }
 0x2a7   : > { %v884_v25 = vpop.xlane.xlu1 %883 }
 0x2a8   : > { %v900_v27 = vsub.f32 %v868_v55, %v884_v25 }
 0x2aa   : > { %v911_v29 = vmul.f32 1.442695, %v900_v27  ;;  %v887_v30 = vpop.xlane.xlu0 %886  ;;  %v3094_v27 = vld [vmem:[%s3029_s28 + $0x20] sm:$0xff] }
 0x2ab   : > { %v901_v34 = vsub.f32 %v869_v62, %v887_v30 }
 0x2ac   : > { %2708 = vpow2.f32 %v911_v29 }
 0x2ad   : > { %v913_v42 = vmul.f32 1.442695, %v901_v34  ;;  %v3106_v34 = vld [vmem:[%s3029_s28 + $0x30] sm:$0xff] }
 0x2ae   : > { %v881_v31 = vpop.xlane.xlu0 %880 }
 0x2af   : > { %v899_v32 = vsub.f32 %v867_v0, %v881_v31  ;;  %v3047_v0 = vpop.permute.xlu1 %1291 }
 0x2b1   : > { %v2999_v33 = vpop.eup %2704  ;;  %v909_v35 = vmul.f32 1.442695, %v899_v32 }
 0x2b2   : > { %v890_v23 = vpop.xlane.xlu0 %889  ;;  %v924_v36 = vsel %vm506_vm1, %v2999_v33, 0.0 }
 0x2b3   : > { %v3003_v37 = vpop.eup %2706  ;;  %2710 = vpow2.f32 %v909_v35  ;;  %v902_v39 = vsub.f32 %v870_v3, %v890_v23  ;;  %925 = vadd.xlane.f32.xlu0 %v924_v36  ;;  %v3054_v3 = vpop.permute.xlu1 %1382 }
 0x2b4   : > { %v921_v41 = vsel %vm506_vm1, %v3003_v37, 0.0 }
 0x2b5   : > { %v915_v43 = vmul.f32 1.442695, %v902_v39  ;;  %922 = vadd.xlane.f32.xlu1 %v921_v41 }
 0x2b6   : > { %v896_v44 = vpop.xlane.xlu0 %895 }
 0x2b7   : > { %2712 = vpow2.f32 %v915_v43  ;;  %v904_v45 = vsub.f32 %v872_v7, %v896_v44  ;;  %v1286_v6 = vpop.permute.xlu1 %1285 }
 0x2b8   : > { %2714 = vpow2.f32 %v913_v42 }
 0x2b9   : > { %v3007_v47 = vpop.eup %2708  ;;  %v919_v48 = vmul.f32 1.442695, %v904_v45 }
 0x2ba   : > { %v930_v49 = vsel %vm506_vm1, %v3007_v47, 0.0 }
 0x2bb   : > { %931 = vadd.xlane.f32.xlu1 %v930_v49  ;;  %2716 = vpow2.f32 %v919_v48  ;;  %v3067_v7 = vpop.permute.xlu1 %1380 }
 0x2c0   : > { %v3011_v50 = vpop.eup %2710 }
 0x2c1   : > { %v927_v53 = vsel %vm506_vm1, %v3011_v50, 0.0 }
 0x2c2   : > { %928 = vadd.xlane.f32.xlu1 %v927_v53 }
 0x2c4   : > { %v3015_v54 = vpop.eup %2712 }
 0x2c5   : > { %v936_v55 = vsel %vm506_vm1, %v3015_v54, 0.0  ;;  %v3019_v56 = vpop.eup %2714 }
 0x2c6   : > { %937 = vadd.xlane.f32.xlu0 %v936_v55  ;;  %v933_v57 = vsel %vm506_vm1, %v3019_v56, 0.0 }
 0x2c8   : > { %v3023_v59 = vpop.eup %2716 }
 0x2c9   : > { %v942_v62 = vsel %vm506_vm1, %v3023_v59, 0.0 }
 0x2ca   : > { %934 = vadd.xlane.f32.xlu0 %v933_v57 }
 0x2ce   : > { %943 = vadd.xlane.f32.xlu0 %v942_v62 }
 0x2d3   : > { %1471 = vrot.lane.b32.xlu1 %v2871_v22, %s2777_s21 }
 0x2e4   : > { %1378 = vrot.lane.b32.xlu0 %v2867_v20, %s2778_s22  ;;  %v1290_v20 = vpop.permute.xlu0 %1289 }
 0x2e8   : > { %1564 = vrot.lane.b32.xlu0 %v2883_v26, %s2777_s21  ;;  %v893_v8 = vpop.xlane.xlu1 %892 }
 0x2e9   : > { %v903_v9 = vsub.f32 %v2993_v13, %v893_v8 }
 0x2eb   : > { %v917_v11 = vmul.f32 1.442695, %v903_v9 }
 0x2ec   : > { %1469 = vrot.lane.b32.xlu0 %v2877_v24, %s2778_s22  ;;  %v1288_v24 = vpop.permute.xlu0 %1287  ;;  %v3088_v14 = vpop.permute.xlu1 %1376 }
 0x2ed   : > { %2718 = vpow2.f32 %v917_v11 }
 0x2f0   : > { %1558 = vrot.lane.b32.xlu0 %v2887_v28, %s2778_s22  ;;  %v1474_v13 = vpop.permute.xlu0 %1473 }
 0x2fa   : > { %v3078_v12 = vpop.eup %2718 }
 0x2fb   : > { %v939_v15 = vsel %vm506_vm1, %v3078_v12, 0.0 }
 0x2fc   : > { %940 = vadd.xlane.f32.xlu1 %v939_v15 }
 0x30d   : > { %1467 = vrot.lane.b32.xlu1 %v2871_v22, %s2778_s22 }
 0x311   : > { %1562 = vrot.lane.b32.xlu1 %v2887_v28, %s2777_s21 }
 0x315   : > { %1560 = vrot.lane.b32.xlu1 %v2883_v26, %s2778_s22 }
 0x33c   : > { %v926_v16 = vpop.xlane.xlu0 %925 }
 0x33d   : > { %2720 = vrcp.f32 %v926_v16 }
 0x33e   : > { %v923_v17 = vpop.xlane.xlu1 %922 }
 0x33f   : > { %2722 = vrcp.f32 %v923_v17 }
 0x344   : > { %v932_v18 = vpop.xlane.xlu1 %931 }
 0x345   : > { %2724 = vrcp.f32 %v932_v18 }
 0x34a   : > { %v2721_v19 = vpop.eup %2720 }
 0x34b   : > { %v929_v22 = vpop.xlane.xlu1 %928  ;;  %v954_v26 = vmul.f32 %v2721_v19, %v2999_v33 }
 0x34c   : > { %v2723_v21 = vpop.eup %2722  ;;  %2726 = vrcp.f32 %v929_v22 }
 0x34d   : > { %v953_v28 = vmul.f32 %v2723_v21, %v3003_v37 }
 0x34f   : > { %v938_v25 = vpop.xlane.xlu0 %937  ;;  %2584 = vmatprep.mubr.msk.f32.mxu0 %vm506_vm1, %v953_v28  ;;  %v1472_v39 = vpop.permute.xlu1 %1471 }
 0x350   : > { %2585 = vmatmul.mubr.msk.f32.vlgmr.msra.gmra.mxu0 %vm506_vm1, %v954_v26  ;;  %2728 = vrcp.f32 %v938_v25 }
 0x351   : > { %2595 = vmatpush3.msra.mxu0 %v3044_v63 }
 0x352   : > { %2596 = vmatprep.subr.mxu0 %v3094_v27  ;;  %v2725_v30 = vpop.eup %2724 }
 0x353   : > { %v935_v29 = vpop.xlane.xlu0 %934  ;;  %2597 = vmatpush3.msra.mxu0 %v3094_v27  ;;  %v956_v33 = vmul.f32 %v2725_v30, %v3007_v47 }
 0x354   : > { %2730 = vrcp.f32 %v935_v29  ;;  %2608 = vmatprep.subr.msk.mxu0 %vm506_vm1, %v3047_v0 }
 0x357   : > { %v944_v41 = vpop.xlane.xlu0 %943 }
 0x358   : > { %2732 = vrcp.f32 %v944_v41 }
 0x359   : > { %v2727_v31 = vpop.eup %2726 }
 0x35a   : > { %v955_v32 = vmul.f32 %v2727_v31, %v3011_v50 }
 0x35b   : > { %v1379_v42 = vpop.permute.xlu0 %1378 }
 0x35c   : > { %2591 = vmatprep.mubr.msk.f32.mxu1 %vm506_vm1, %v955_v32 }
 0x35d   : > { %2592 = vmatmul.mubr.msk.f32.vlgmr.msra.gmra.mxu1 %vm506_vm1, %v956_v33  ;;  %v2729_v35 = vpop.eup %2728 }
 0x35e   : > { %2602 = vmatpush3.msra.mxu1 %v3064_v5  ;;  %v958_v37 = vmul.f32 %v2729_v35, %v3015_v54 }
 0x35f   : > { %2603 = vmatprep.subr.mxu1 %v3106_v34  ;;  %v1565_v43 = vpop.permute.xlu0 %1564 }
 0x360   : > { %2604 = vmatpush3.msra.mxu1 %v3106_v34 }
 0x361   : > { %v2731_v23 = vpop.eup %2730  ;;  %2615 = vmatprep.subr.msk.mxu1 %vm506_vm1, %v3054_v3 }
 0x362   : > { %v957_v36 = vmul.f32 %v2731_v23, %v3019_v56 }
 0x363   : > { %v1470_v47 = vpop.permute.xlu0 %1469 }
 0x364   : > { %2598 = vmatprep.mubr.msk.f32.mxu0 %vm506_vm1, %v957_v36 }
 0x365   : > { %2599 = vmatmul.mubr.msk.f32.vlgmr.msra.gmra.mxu0 %vm506_vm1, %v958_v37  ;;  %v2733_v48 = vpop.eup %2732 }
 0x366   : > { %2609 = vmatpush3.xpose.msk.msra.mxu0 %vm506_vm1, %v3047_v0  ;;  %2612 = vmatprep.mubr.msk.f32.mxu0 %vm506_vm1, %v1286_v6  ;;  %v960_v53 = vmul.f32 %v2733_v48, %v3023_v59  ;;  %v491_v0 = vld [vmem:[%s3287_s2 + $0x18] sm:$0xff] }
 0x367   : > { %2610 = vmatprep.subr.msk.mxu0 %vm506_vm1, %v1290_v20  ;;  %v1559_v54 = vpop.permute.xlu0 %1558  ;;  %v1650_v6 = vadd.f32 %v2924_v38, %v491_v0  ;;  %v1652_v26 = vadd.f32 %v2939_v46, %v491_v0  ;;  %v1654_v29 = vadd.f32 %v2959_v58, %v491_v0  ;;  %v1656_v23 = vadd.f32 %v2967_v2, %v491_v0 }
 0x36a   : > { %2611 = vmatpush3.xpose.msk.msra.mxu0 %vm506_vm1, %v1290_v20 }
 0x36b   : > { %2622 = vmatprep.subr.msk.mxu0 %vm506_vm1, %v1474_v13 }
 0x36d   : > { %2613 = vmatmul.mubr.msk.f32.vlgmr.msra.gmra.mxu0 %vm506_vm1, %v1288_v24 }
 0x36e   : > { %2623 = vmatpush3.xpose.msk.msra.mxu0 %vm506_vm1, %v1474_v13 }
 0x36f   : > { %2624 = vmatprep.subr.msk.mxu0 %vm506_vm1, %v1472_v39 }
 0x372   : > { %2625 = vmatpush3.xpose.msk.msra.mxu0 %vm506_vm1, %v1472_v39 }
 0x385   : > { %v941_v44 = vpop.xlane.xlu1 %940 }
 0x386   : > { %2734 = vrcp.f32 %v941_v44 }
 0x389   : > { %v1468_v45 = vpop.permute.xlu1 %1467 }
 0x38a   : > { %2626 = vmatprep.mubr.msk.f32.mxu0 %vm506_vm1, %v1468_v45 }
 0x38b   : > { %2627 = vmatmul.mubr.msk.f32.vlgmr.msra.gmra.mxu0 %vm506_vm1, %v1470_v47 }
 0x38d   : > { %v1563_v55 = vpop.permute.xlu1 %1562 }
 0x391   : > { %v1561_v56 = vpop.permute.xlu1 %1560 }
 0x393   : > { %v2735_v49 = vpop.eup %2734 }
 0x394   : > { %v959_v50 = vmul.f32 %v2735_v49, %v3078_v12 }
 0x396   : > { %2605 = vmatprep.mubr.msk.f32.mxu1 %vm506_vm1, %v959_v50 }
 0x397   : > { %2606 = vmatmul.mubr.msk.f32.vlgmr.msra.gmra.mxu1 %vm506_vm1, %v960_v53 }
 0x398   : > { %2616 = vmatpush3.xpose.msk.msra.mxu1 %vm506_vm1, %v3054_v3  ;;  %2619 = vmatprep.mubr.msk.f32.mxu1 %vm506_vm1, %v3088_v14  ;;  %v490_v3 = vld [vmem:[%s3287_s2 + $0x10] sm:$0xff] }
 0x399   : > { %2617 = vmatprep.subr.msk.mxu1 %vm506_vm1, %v3067_v7  ;;  %v1649_v8 = vadd.f32 %v2932_v40, %v490_v3  ;;  %v1653_v13 = vadd.f32 %v2947_v51, %v490_v3  ;;  %v1651_v21 = vadd.f32 %v2952_v52, %v490_v3  ;;  %v1655_v32 = vadd.f32 %v2990_v10, %v490_v3 }
 0x39c   : > { %2618 = vmatpush3.xpose.msk.msra.mxu1 %vm506_vm1, %v3067_v7 }
 0x39d   : > { %2629 = vmatprep.subr.msk.mxu1 %vm506_vm1, %v1565_v43 }
 0x39f   : > { %2620 = vmatmul.mubr.msk.f32.vlgmr.msra.gmra.mxu1 %vm506_vm1, %v1379_v42 }
 0x3a0   : > { %2630 = vmatpush3.xpose.msk.msra.mxu1 %vm506_vm1, %v1565_v43  ;;  %2633 = vmatprep.mubr.msk.f32.mxu1 %vm506_vm1, %v1559_v54 }
 0x3a1   : > { %2631 = vmatprep.subr.msk.mxu1 %vm506_vm1, %v1563_v55 }
 0x3a4   : > { %2632 = vmatpush3.xpose.msk.msra.mxu1 %vm506_vm1, %v1563_v55 }
 0x3a7   : > { %2634 = vmatmul.mubr.msk.f32.vlgmr.msra.gmra.mxu1 %vm506_vm1, %v1561_v56 }
 0x410   : > { %v3149_v57 = vpop.f32.mrf.mxu0 }
 0x412   : > { %v3151_v59 = vpop.f32.mrf.mxu0 }
 0x41d   : > { %v3169_v18 = vpop.f32.mrf.mxu1 }
 0x41f   : > { %v3171_v40 = vpop.f32.mrf.mxu1 }
 0x425   : > { %v3153_v62 = vpop.f32.mrf.mxu0 }
 0x427   : > { %v3162_v7 = vpop.f32.mrf.mxu0 }
 0x42d   : > { %v2614_v9 = vpop.f32.mrf.mxu0 }
 0x42e   : > { %v1658_v11 = vadd.f32 %v2614_v9, %v1650_v6 }
 0x42f   : > { %v1367_v12 = vpop.f32.mrf.mxu0 }
 0x430   : > { %v1657_v15 = vadd.f32 %v1649_v8, %v1367_v12  ;;  %v1668_v20 = vsel %vm506_vm1, %v1658_v11, -inf }
 0x431   : > { %1669 = vmax.xlane.f32.xlu1 %v1668_v20 }
 0x432   : > { %v1665_v24 = vsel %vm506_vm1, %v1657_v15, -inf }
 0x433   : > { %1666 = vmax.xlane.f32.xlu0 %v1665_v24 }
 0x44b   : > { %v2628_v14 = vpop.f32.mrf.mxu0 }
 0x44c   : > { %v1662_v35 = vadd.f32 %v2628_v14, %v1654_v29 }
 0x44d   : > { %v1549_v16 = vpop.f32.mrf.mxu0 }
 0x44e   : > { %v1661_v17 = vadd.f32 %v1653_v13, %v1549_v16  ;;  %v1680_v39 = vsel %vm506_vm1, %v1662_v35, -inf }
 0x450   : > { %v1677_v38 = vsel %vm506_vm1, %v1661_v17, -inf }
 0x451   : > { %1678 = vmax.xlane.f32.xlu1 %v1677_v38 }
 0x457   : > { %v3173_v19 = vpop.f32.mrf.mxu1 }
 0x459   : > { %v3175_v22 = vpop.f32.mrf.mxu1 }
 0x45f   : > { %v2621_v28 = vpop.f32.mrf.mxu1 }
 0x460   : > { %v1660_v30 = vadd.f32 %v2621_v28, %v1652_v26 }
 0x461   : > { %v1458_v51 = vpop.f32.mrf.mxu1 }
 0x462   : > { %v1659_v25 = vadd.f32 %v1651_v21, %v1458_v51  ;;  %v1674_v36 = vsel %vm506_vm1, %v1660_v30, -inf }
 0x464   : > { %v1671_v31 = vsel %vm506_vm1, %v1659_v25, -inf }
 0x465   : > { %1672 = vmax.xlane.f32.xlu0 %v1671_v31 }
 0x467   : > { %v2635_v33 = vpop.f32.mrf.mxu1 }
 0x468   : > { %v1664_v46 = vadd.f32 %v2635_v33, %v1656_v23 }
 0x469   : > { %1675 = vmax.xlane.f32.xlu0 %v1674_v36  ;;  %v1640_v52 = vpop.f32.mrf.mxu1 }
 0x46a   : > { %v1663_v37 = vadd.f32 %v1655_v32, %v1640_v52  ;;  %v1686_v41 = vsel %vm506_vm1, %v1664_v46, -inf }
 0x46c   : > { %v1683_v58 = vsel %vm506_vm1, %v1663_v37, -inf }
 0x46d   : > { %1681 = vmax.xlane.f32.xlu0 %v1680_v39  ;;  %1684 = vmax.xlane.f32.xlu1 %v1683_v58 }
 0x471   : > { %1687 = vmax.xlane.f32.xlu0 %v1686_v41 }
 0x47e   : > { %1757 = vrot.lane.b32.xlu1 %v3032_v60, %s2778_s22 }
 0x482   : > { %1846 = vrot.lane.b32.xlu1 %v3052_v1, %s2778_s22 }
 0x486   : > { %1844 = vrot.lane.b32.xlu1 %v3058_v4, %s2778_s22 }
 0x487   : > { %1755 = vrot.lane.b32.xlu0 %v3036_v61, %s2778_s22 }
 0x48a   : > { %1933 = vrot.lane.b32.xlu1 %v3094_v27, %s2778_s22 }
 0x48b   : > { %1935 = vrot.lane.b32.xlu0 %v3044_v63, %s2778_s22 }
 0x4ba   : > { %v1670_v2 = vpop.xlane.xlu1 %1669 }
 0x4bb   : > { %v1690_v10 = vsub.f32 %v1658_v11, %v1670_v2 }
 0x4bc   : > { %v1667_v42 = vpop.xlane.xlu0 %1666 }
 0x4bd   : > { %v1699_v43 = vmul.f32 1.442695, %v1690_v10  ;;  %v1689_v60 = vsub.f32 %v1657_v15, %v1667_v42 }
 0x4bf   : > { %2736 = vpow2.f32 %v1699_v43  ;;  %v1697_v44 = vmul.f32 1.442695, %v1689_v60 }
 0x4c1   : > { %2738 = vpow2.f32 %v1697_v44 }
 0x4cc   : > { %v3199_v1 = vpop.eup %2736 }
 0x4cd   : > { %v1716_v4 = vsel %vm506_vm1, %v3199_v1, 0.0 }
 0x4ce   : > { %v3203_v61 = vpop.eup %2738  ;;  %1717 = vadd.xlane.f32.xlu0 %v1716_v4 }
 0x4cf   : > { %v1713_v27 = vsel %vm506_vm1, %v3203_v61, 0.0 }
 0x4d0   : > { %1714 = vadd.xlane.f32.xlu1 %v1713_v27 }
 0x4da   : > { %v1679_v63 = vpop.xlane.xlu1 %1678 }
 0x4db   : > { %v1693_v45 = vsub.f32 %v1661_v17, %v1679_v63 }
 0x4dd   : > { %v1705_v47 = vmul.f32 1.442695, %v1693_v45 }
 0x4df   : > { %2740 = vpow2.f32 %v1705_v47 }
 0x4ec   : > { %v3207_v48 = vpop.eup %2740 }
 0x4ed   : > { %v1725_v49 = vsel %vm506_vm1, %v3207_v48, 0.0 }
 0x4ee   : > { %v1673_v50 = vpop.xlane.xlu0 %1672  ;;  %1726 = vadd.xlane.f32.xlu1 %v1725_v49 }
 0x4ef   : > { %v1691_v53 = vsub.f32 %v1659_v25, %v1673_v50 }
 0x4f1   : > { %v1701_v54 = vmul.f32 1.442695, %v1691_v53  ;;  %v2152_v53 = vld [vmem:[%s3291_s6 + $0x18] sm:$0xff] }
 0x4f2   : > { %v1676_v55 = vpop.xlane.xlu0 %1675 }
 0x4f3   : > { %2742 = vpow2.f32 %v1701_v54  ;;  %v1692_v56 = vsub.f32 %v1660_v30, %v1676_v55  ;;  %v2151_v54 = vld [vmem:[%s3291_s6 + $0x10] sm:$0xff]  ;;  %v2150_v55 = vld [vmem:[%s3291_s6 + $0x8] sm:$0xff] }
 0x4f5   : > { %v1703_v9 = vmul.f32 1.442695, %v1692_v56  ;;  %v2149_v56 = vld [vmem:[%s3291_s6] sm:$0xff] }
 0x4f6   : > { %v1682_v0 = vpop.xlane.xlu0 %1681  ;;  %v1685_v3 = vpop.xlane.xlu1 %1684 }
 0x4f7   : > { %v1694_v6 = vsub.f32 %v1662_v35, %v1682_v0  ;;  %v1695_v8 = vsub.f32 %v1663_v37, %v1685_v3 }
 0x4f9   : > { %v1707_v11 = vmul.f32 1.442695, %v1694_v6  ;;  %v1709_v12 = vmul.f32 1.442695, %v1695_v8 }
 0x4fa   : > { %v1688_v15 = vpop.xlane.xlu0 %1687  ;;  %v1758_v20 = vpop.permute.xlu1 %1757 }
 0x4fb   : > { %2744 = vpow2.f32 %v1707_v11  ;;  %v1696_v24 = vsub.f32 %v1664_v46, %v1688_v15  ;;  %2636 = vmatprep.subr.mxu0 %v1758_v20 }
 0x4fc   : > { %2746 = vpow2.f32 %v1709_v12  ;;  %2637 = vmatpush3.msra.mxu0 %v1758_v20 }
 0x4fd   : > { %2748 = vpow2.f32 %v1703_v9  ;;  %v1711_v13 = vmul.f32 1.442695, %v1696_v24 }
 0x4fe   : > { %v1847_v14 = vpop.permute.xlu1 %1846  ;;  %v1756_v16 = vpop.permute.xlu0 %1755 }
 0x4ff   : > { %2643 = vmatprep.subr.mxu1 %v1847_v14  ;;  %2638 = vmatprep.subr.mxu0 %v1756_v16  ;;  %2750 = vpow2.f32 %v1711_v13 }
 0x500   : > { %v2743_v17 = vpop.eup %2742  ;;  %2644 = vmatpush3.msra.mxu1 %v1847_v14  ;;  %2639 = vmatpush3.msra.mxu0 %v1756_v16 }
 0x501   : > { %v1719_v38 = vsel %vm506_vm1, %v2743_v17, 0.0 }
 0x502   : > { %1720 = vadd.xlane.f32.xlu1 %v1719_v38  ;;  %v1845_v21 = vpop.permute.xlu1 %1844  ;;  %v1936_v28 = vpop.permute.xlu0 %1935 }
 0x503   : > { %2645 = vmatprep.subr.mxu1 %v1845_v21  ;;  %2650 = vmatprep.subr.mxu0 %v1936_v28 }
 0x504   : > { %2646 = vmatpush3.msra.mxu1 %v1845_v21 }
 0x506   : > { %v1934_v35 = vpop.permute.xlu1 %1933 }
 0x508   : > { %v2745_v26 = vpop.eup %2744 }
 0x509   : > { %v2747_v51 = vpop.eup %2746  ;;  %v1728_v25 = vsel %vm506_vm1, %v2745_v26, 0.0 }
 0x50a   : > { %v2749_v29 = vpop.eup %2748  ;;  %1729 = vadd.xlane.f32.xlu0 %v1728_v25  ;;  %v1731_v30 = vsel %vm506_vm1, %v2747_v51, 0.0 }
 0x50b   : > { %1732 = vadd.xlane.f32.xlu1 %v1731_v30  ;;  %v1722_v31 = vsel %vm506_vm1, %v2749_v29, 0.0 }
 0x50c   : > { %v2751_v32 = vpop.eup %2750 }
 0x50d   : > { %v1734_v33 = vsel %vm506_vm1, %v2751_v32, 0.0 }
 0x50e   : > { %1723 = vadd.xlane.f32.xlu0 %v1722_v31 }
 0x512   : > { %1735 = vadd.xlane.f32.xlu0 %v1734_v33 }
 0x51c   : > { %2022 = vrot.lane.b32.xlu1 %v3106_v34, %s2778_s22 }
 0x528   : > { %2024 = vrot.lane.b32.xlu0 %v3064_v5, %s2778_s22 }
 0x557   : > { %v1718_v23 = vpop.xlane.xlu0 %1717 }
 0x558   : > { %2752 = vrcp.f32 %v1718_v23 }
 0x559   : > { %v1715_v36 = vpop.xlane.xlu1 %1714 }
 0x55a   : > { %2754 = vrcp.f32 %v1715_v36 }
 0x565   : > { %v2753_v52 = vpop.eup %2752 }
 0x566   : > { %v1746_v39 = vmul.f32 %v2753_v52, %v3199_v1 }
 0x567   : > { %v2755_v37 = vpop.eup %2754 }
 0x568   : > { %v1745_v46 = vmul.f32 %v2755_v37, %v3203_v61 }
 0x56a   : > { %2640 = vmatprep.mubr.msk.f32.mxu0 %vm506_vm1, %v1745_v46 }
 0x56b   : > { %2641 = vmatmul.mubr.msk.f32.vlgmr.msra.gmra.mxu0 %vm506_vm1, %v1746_v39 }
 0x56c   : > { %2651 = vmatpush3.msra.mxu0 %v1936_v28 }
 0x56d   : > { %2652 = vmatprep.subr.mxu0 %v1934_v35 }
 0x56e   : > { %2653 = vmatpush3.msra.mxu0 %v1934_v35 }
 0x56f   : > { %2664 = vmatprep.subr.mxu0 %v2152_v53 }
 0x577   : > { %v1727_v34 = vpop.xlane.xlu1 %1726 }
 0x578   : > { %2756 = vrcp.f32 %v1727_v34 }
 0x585   : > { %v2757_v5 = vpop.eup %2756 }
 0x586   : > { %v1749_v58 = vmul.f32 %v2757_v5, %v3207_v48 }
 0x588   : > { %2654 = vmatprep.mubr.msk.f32.mxu0 %vm506_vm1, %v1749_v58 }
 0x58b   : > { %v1721_v41 = vpop.xlane.xlu1 %1720 }
 0x58c   : > { %2758 = vrcp.f32 %v1721_v41 }
 0x593   : > { %v1730_v2 = vpop.xlane.xlu0 %1729 }
 0x594   : > { %2760 = vrcp.f32 %v1730_v2  ;;  %v1733_v10 = vpop.xlane.xlu1 %1732 }
 0x595   : > { %2762 = vrcp.f32 %v1733_v10 }
 0x597   : > { %v1724_v42 = vpop.xlane.xlu0 %1723 }
 0x598   : > { %2764 = vrcp.f32 %v1724_v42  ;;  %v2023_v48 = vpop.permute.xlu1 %2022 }
 0x599   : > { %v2759_v43 = vpop.eup %2758 }
 0x59a   : > { %v1747_v60 = vmul.f32 %v2759_v43, %v2743_v17 }
 0x59b   : > { %v1736_v44 = vpop.xlane.xlu0 %1735 }
 0x59c   : > { %2766 = vrcp.f32 %v1736_v44  ;;  %2647 = vmatprep.mubr.msk.f32.mxu1 %vm506_vm1, %v1747_v60 }
 0x59f   : > { %v2025_v1 = vpop.permute.xlu0 %2024 }
 0x5a0   : > { %2657 = vmatprep.subr.mxu1 %v2025_v1 }
 0x5a1   : > { %v2761_v4 = vpop.eup %2760 }
 0x5a2   : > { %v1750_v61 = vmul.f32 %v2761_v4, %v2745_v26  ;;  %v2763_v27 = vpop.eup %2762 }
 0x5a3   : > { %v1751_v47 = vmul.f32 %v2763_v27, %v2747_v51 }
 0x5a4   : > { %2655 = vmatmul.mubr.msk.f32.vlgmr.msra.gmra.mxu0 %vm506_vm1, %v1750_v61 }
 0x5a5   : > { %v2765_v63 = vpop.eup %2764  ;;  %2665 = vmatpush3.msra.mxu0 %v2152_v53 }
 0x5a6   : > { %v1748_v45 = vmul.f32 %v2765_v63, %v2749_v29  ;;  %2666 = vmatprep.subr.mxu0 %v2151_v54 }
 0x5a7   : > { %2667 = vmatpush3.msra.mxu0 %v2151_v54 }
 0x5a8   : > { %2648 = vmatmul.mubr.msk.f32.vlgmr.msra.gmra.mxu1 %vm506_vm1, %v1748_v45  ;;  %2668 = vmatprep.subr.mxu0 %v2150_v55 }
 0x5a9   : > { %v2767_v49 = vpop.eup %2766  ;;  %2658 = vmatpush3.msra.mxu1 %v2025_v1  ;;  %2661 = vmatprep.mubr.msk.f32.mxu1 %vm506_vm1, %v1751_v47 }
 0x5aa   : > { %2659 = vmatprep.subr.mxu1 %v2023_v48  ;;  %v1752_v50 = vmul.f32 %v2767_v49, %v2751_v32  ;;  %2669 = vmatpush3.msra.mxu0 %v2150_v55 }
 0x5ab   : > { %2660 = vmatpush3.msra.mxu1 %v2023_v48  ;;  %2670 = vmatprep.subr.mxu0 %v2149_v56 }
 0x5ac   : > { %2662 = vmatmul.mubr.msk.f32.vlgmr.msra.gmra.mxu1 %vm506_vm1, %v1752_v50  ;;  %2671 = vmatpush3.msra.mxu0 %v2149_v56 }
 0x62b   : > { %v2642_v0 = vpop.f32.mrf.mxu0 }
 0x62c   : > { %2119 = vrot.lane.b32.xlu1 %v2642_v0, %s2779_s20 }
 0x62d   : > { %v1833_v3 = vpop.f32.mrf.mxu0 }
 0x62e   : > { %2117 = vrot.lane.b32.xlu0 %v1833_v3, %s2779_s20 }
 0x664   : > { %v2656_v8 = vpop.f32.mrf.mxu0 }
 0x666   : > { %v2011_v11 = vpop.f32.mrf.mxu0 }
 0x668   : > { %v2649_v6 = vpop.f32.mrf.mxu1 }
 0x669   : > { %2123 = vrot.lane.b32.xlu1 %v2649_v6, %s2779_s20 }
 0x66a   : > { %v1922_v9 = vpop.f32.mrf.mxu1 }
 0x66b   : > { %2121 = vrot.lane.b32.xlu0 %v1922_v9, %s2779_s20 }
 0x66c   : > { %v2663_v12 = vpop.f32.mrf.mxu1 }
 0x66d   : > { %2127 = vrot.lane.b32.xlu1 %v2656_v8, %s2779_s20 }
 0x66e   : > { %v2100_v15 = vpop.f32.mrf.mxu1 }
 0x66f   : > { %2125 = vrot.lane.b32.xlu0 %v2011_v11, %s2779_s20 }
 0x671   : > { %2131 = vrot.lane.b32.xlu1 %v2663_v12, %s2779_s20 }
 0x673   : > { %2129 = vrot.lane.b32.xlu0 %v2100_v15, %s2779_s20 }
 0x69e   : > { %v2120_v20 = vpop.permute.xlu1 %2119 }
 0x69f   : > { %v2142_v14 = vsel %vm506_vm1, %v3149_v57, %v2120_v20 }
 0x6a0   : > { %v2118_v24 = vpop.permute.xlu0 %2117 }
 0x6a1   : > { %v2141_v13 = vsel %vm506_vm1, %v3151_v59, %v2118_v24 }
 0x6a2   : > { %2672 = vmatprep.mubr.msk.f32.mxu0 %vm350_vm0, %v2141_v13 }
 0x6a3   : > { %2673 = vmatmul.mubr.msk.f32.vlgmr.msra.gmra.mxu0 %vm350_vm0, %v2142_v14 }
 0x6db   : > { %v2124_v16 = vpop.permute.xlu1 %2123 }
 0x6dc   : > { %v2144_v21 = vsel %vm506_vm1, %v3169_v18, %v2124_v16 }
 0x6dd   : > { %v2122_v17 = vpop.permute.xlu0 %2121 }
 0x6de   : > { %v2143_v38 = vsel %vm506_vm1, %v3171_v40, %v2122_v17 }
 0x6df   : > { %2675 = vmatprep.mubr.msk.f32.mxu0 %vm350_vm0, %v2143_v38  ;;  %v2128_v28 = vpop.permute.xlu1 %2127 }
 0x6e0   : > { %2676 = vmatmul.mubr.msk.f32.gmra.mxu0 %vm350_vm0, %v2144_v21  ;;  %v2146_v26 = vsel %vm506_vm1, %v3153_v62, %v2128_v28  ;;  %v2433_v62 = vld [vmem:[%s3292_s7] ss:$0 sm:$0xff] }
 0x6e1   : > { %v2126_v59 = vpop.permute.xlu0 %2125 }
 0x6e2   : > { %v2145_v57 = vsel %vm506_vm1, %v3162_v7, %v2126_v59 }
 0x6e3   : > { %2678 = vmatprep.mubr.msk.f32.mxu0 %vm350_vm0, %v2145_v57  ;;  %v2132_v51 = vpop.permute.xlu1 %2131 }
 0x6e4   : > { %2679 = vmatmul.mubr.msk.f32.gmra.mxu0 %vm350_vm0, %v2146_v26  ;;  %v2148_v25 = vsel %vm506_vm1, %v3173_v19, %v2132_v51 }
 0x6e5   : > { %v2130_v40 = vpop.permute.xlu0 %2129 }
 0x6e6   : > { %v2147_v18 = vsel %vm506_vm1, %v3175_v22, %v2130_v40 }
 0x6e7   : > { %2681 = vmatprep.mubr.msk.f32.mxu0 %vm350_vm0, %v2147_v18 }
 0x6e8   : > { %2682 = vmatmul.mubr.msk.f32.gmra.mxu0 %vm350_vm0, %v2148_v25 }
 0x763   : > { %v2674_v7 = vpop.f32.mrf.mxu0 }
 0x764   : > { %v2256_v29 = vadd.f32 %v2674_v7, %v2433_v62 }
 0x765   : > { %v2250_v30 = vpop.f32.mrf.mxu0 }
 0x766   : > { %2290 = vst.msk [vmem:[%s329_s25 + $0x8] sm:$0xff] %vm350_vm0, %v2256_v29  ;;  %v2251_v22 = vadd.f32 %v2433_v62, %v2250_v30 }
 0x768   : > { %2289 = vst.msk [vmem:[%s329_s25] sm:$0xff] %vm350_vm0, %v2251_v22 }
 0x7a0   : > { %v2677_v19 = vpop.f32.mrf.mxu0 }
 0x7a1   : > { %v2266_v31 = vadd.f32 %v2677_v19, %v2433_v62 }
 0x7a2   : > { %v2260_v32 = vpop.f32.mrf.mxu0 }
 0x7a3   : > { %2292 = vst.msk [vmem:[%s329_s25 + $0x18] sm:$0xff] %vm350_vm0, %v2266_v31  ;;  %v2261_v33 = vadd.f32 %v2433_v62, %v2260_v32 }
 0x7a4   : > { %v2680_v35 = vpop.f32.mrf.mxu0 }
 0x7a5   : > { %2291 = vst.msk [vmem:[%s329_s25 + $0x10] sm:$0xff] %vm350_vm0, %v2261_v33  ;;  %v2276_v23 = vadd.f32 %v2680_v35, %v2433_v62 }
 0x7a6   : > { %v2270_v36 = vpop.f32.mrf.mxu0 }
 0x7a7   : > { %2294 = vst.msk [vmem:[%s329_s25 + $0x28] sm:$0xff] %vm350_vm0, %v2276_v23  ;;  %v2271_v52 = vadd.f32 %v2433_v62, %v2270_v36 }
 0x7a8   : > { %v2683_v37 = vpop.f32.mrf.mxu0 }
 0x7a9   : > { %2293 = vst.msk [vmem:[%s329_s25 + $0x20] sm:$0xff] %vm350_vm0, %v2271_v52  ;;  %v2286_v46 = vadd.f32 %v2683_v37, %v2433_v62 }
 0x7aa   : > { %v2280_v39 = vpop.f32.mrf.mxu0 }
 0x7ab   : > { %2296 = vst.msk [vmem:[%s329_s25 + $0x38] sm:$0xff] %vm350_vm0, %v2286_v46  ;;  %v2281_v34 = vadd.f32 %v2433_v62, %v2280_v39 }
 0x7ad   : > { %2295 = vst.msk [vmem:[%s329_s25 + $0x30] sm:$0xff] %vm350_vm0, %v2281_v34 }
 0x7ae PF: > { %s18_s27 = sadd.s32 1, %s2774_s27  }
 0x7af   : > { %p15_p4 = scmp.ge.s32.totalorder %s18_s27, 4  }
 0x7b1   :  { %17 = sbr.rel (!%p15_p4) target bundleno = 1 (0x1), region = 85 }

</bundles_post_ra>
